<compile_context>
chip_gen: v5e
topology: v5e:2x2
jax: 0.10.0
libtpu: 0.0.40
codegen_flags: <defaults>
</compile_context>

<pallas_src>
import math

import jax
import jax.numpy as jnp
from jax import lax
from jax.experimental import pallas as pl
from jax.experimental.pallas import tpu as pltpu

# ---- static configuration (small synthetic shapes consistent with the module) ----
B = 2             # batch
N_NODE = 16       # num_of_node
N_PAT = 32        # num_of_pattern
T = 32            # number of time frames
STRIDE = 8        # MaxPool1d kernel == stride
TOPK = 3
THRESHOLD = 0.3   # args.threshold
RATIO = TOPK * N_PAT / N_NODE          # off-diagonal scale of the graph (= 6.0)
LANES = 128                            # native lane width of the fused RHS slab

assert B * T + N_PAT <= LANES
assert T % STRIDE == 0 and (STRIDE & (STRIDE - 1)) == 0   # power-of-two stride (window mask)


# ---------------------------------------------------------------------------
# Single fused kernel: pattern norm + top-K(|.|) + SigLoss + Relaxed_orthloss +
# frame similarity + maxpool(+/-) PES + graphs          (no grid, all in VMEM/SMEM)
# ---------------------------------------------------------------------------
def kpfbnc_kernel(length_ref, pat_ref, rhs_ref, graphs_ref, norm_ref, orth_ref):
    # ---- pattern normalization (rsqrt -> EUP slot) ----
    p = pat_ref[...]                                        # (P, N)
    sumsq = (p * p).sum(-1, keepdims=True)                  # (P, 1)
    inv_norm = lax.rsqrt(sumsq + 1e-9)
    npat = p * inv_norm                                     # normalized_patterns

    # ---- top-K by |value| per row (mirrors torch.topk; lowest-index tie-break) ----
    a = jnp.abs(npat)                                       # all >= 0
    idx = lax.broadcasted_iota(jnp.int32, a.shape, 1)
    mask = jnp.zeros_like(a)
    work = a
    for _ in range(TOPK):
        m = work.max(axis=-1, keepdims=True)
        is_max = work == m
        first = jnp.min(jnp.where(is_max, idx, N_NODE), axis=-1, keepdims=True)
        sel = idx == first
        mask = jnp.where(sel, 1.0, mask)
        work = jnp.where(sel, -1.0, work)                   # finite sentinel < 0 <= |npat|
    topp = mask * npat                                      # toppattern == key_patterns

    # ---- SigLoss(normalized_patterns, toppattern) ----
    lenp = jnp.sqrt(sumsq) * inv_norm                       # ||npat_i||_2
    lentop = jnp.sqrt((topp * topp).sum(-1, keepdims=True))
    norm_ref[0, 0] = jnp.sum((1.0 - lentop / lenp) ** 2) * (1.0 / N_PAT)

    # ---- ONE MXU call: npat @ [frames | patterns^T | pad] -> (P, 128) ----
    rhs = rhs_ref[...]                                      # (N, LANES)
    col_inv = lax.rsqrt((rhs * rhs).sum(axis=0, keepdims=True) + 1e-9)   # per-column 1/||.||
    scaled = lax.dot_general(npat, rhs, (((1,), (0,)), ((), ())),
                             preferred_element_type=jnp.float32) * col_inv
    # lanes [0, B*T)           : similarity_scores.transpose(1,2), batches side by side
    # lanes [B*T, B*T + N_PAT) : npat @ npat.T  (Gram, already normalized on both sides)

    # ---- Relaxed_orthloss(normalized_patterns, threshold) ----
    sim_pp = scaled[:, B * T:B * T + N_PAT]                 # (P, P)
    r = lax.broadcasted_iota(jnp.int32, (N_PAT, N_PAT), 0)
    c = lax.broadcasted_iota(jnp.int32, (N_PAT, N_PAT), 1)
    sim_pp = jnp.where(r == c, 0.0, sim_pp)                 # * (1 - eye)
    relu_scale = 1.0 / (1.0 - THRESHOLD + 1e-5)
    v = jnp.maximum(relu_scale * (jnp.abs(sim_pp) - THRESHOLD), 0.0)
    orth_ref[0, 0] = jnp.sum(v * v) * (1.0 / (N_PAT * N_PAT))

    # ---- MaxPool1d(stride, stride) on +sim and -sim via a roll log-tree ----
    # After shifts of 1,2,4 (gathering from higher lanes), window-start lanes hold the
    # running max / min over their full STRIDE-wide window.  (-sim).max == -(sim.min).
    mx = scaled
    mn = scaled
    k = 1
    while k < STRIDE:
        mx = jnp.maximum(mx, pltpu.roll(mx, LANES - k, axis=1))
        mn = jnp.minimum(mn, pltpu.roll(mn, LANES - k, axis=1))
        k *= 2
    lane = lax.broadcasted_iota(jnp.int32, (1, LANES), 1)
    win_start = (lane & (STRIDE - 1)) == 0                  # window-start lanes
    contrib = jnp.where(win_start, mx - mn, 0.0)            # (P, LANES)

    # ---- per-batch PES columns; graph LHS = [topp*PES_0 | topp*PES_1 | ...] ----
    cols = []
    for b in range(B):
        acc = contrib[:, b * T:(b + 1) * T].sum(axis=-1, keepdims=True)    # (P, 1)
        # size_after_pool = floor(length/stride); splat the SMEM scalar then floor on the VPU
        size_b = jnp.floor((jnp.zeros_like(acc) + length_ref[b]) * (1.0 / STRIDE))
        cols.append(topp * (acc * 0.5 / size_b))            # toppattern * PES[b]
    lhs = jnp.concatenate(cols, axis=1)                     # (P, B*N)

    # ---- graphs for all batches in ONE MXU call, single store ----
    # graphs[b] = key^T @ diag(PES[b]) @ key * non_diag_scale, stacked over b along rows.
    g_all = lax.dot_general(lhs, topp, (((0,), (0,)), ((), ())),
                            preferred_element_type=jnp.float32)            # (B*N, N)
    rg = lax.broadcasted_iota(jnp.int32, (N_NODE, N_NODE), 0)
    cg = lax.broadcasted_iota(jnp.int32, (N_NODE, N_NODE), 1)
    g16 = jnp.where(rg == cg, 1.0, RATIO).astype(jnp.float32)              # non_diag_scale
    graphs_ref[...] = g_all * jnp.concatenate([g16] * B, axis=0)


# ---------------------------------------------------------------------------
# Forward pass (HCP_static path of KPFBNC.forward) — ONE pallas_call
# ---------------------------------------------------------------------------
@jax.jit
def kpfbnc_forward(x, length, patterns):
    # wrapper-side layout plumbing only (no compute hoisted out of the kernel):
    # node-major frame slab + patterns^T + zero pad -> one lane-dense (N, 128) RHS
    x_all = jnp.transpose(x, (1, 0, 2)).reshape(N_NODE, B * T)             # (N, B*T)
    pad = jnp.zeros((N_NODE, LANES - B * T - N_PAT), jnp.float32)
    rhs = jnp.concatenate([x_all, patterns.T.astype(jnp.float32), pad], axis=1)

    graphs_flat, norm_l, orth_l = pl.pallas_call(
        kpfbnc_kernel,
        out_shape=(
            jax.ShapeDtypeStruct((B * N_NODE, N_NODE), jnp.float32),       # graphs (stacked)
            jax.ShapeDtypeStruct((1, 1), jnp.float32),                     # SigLoss
            jax.ShapeDtypeStruct((1, 1), jnp.float32),                     # Relaxed_orthloss
        ),
        in_specs=[
            pl.BlockSpec(memory_space=pltpu.MemorySpace.SMEM),             # length (B,)
            pl.BlockSpec(memory_space=pltpu.MemorySpace.VMEM),             # patterns (P, N)
            pl.BlockSpec(memory_space=pltpu.MemorySpace.VMEM),             # rhs (N, 128)
        ],
        out_specs=(
            pl.BlockSpec(memory_space=pltpu.MemorySpace.VMEM),
            pl.BlockSpec(memory_space=pltpu.MemorySpace.SMEM),
            pl.BlockSpec(memory_space=pltpu.MemorySpace.SMEM),
        ),
    )(length.astype(jnp.float32), patterns.astype(jnp.float32), rhs)

    graphs = graphs_flat.reshape(B, N_NODE, N_NODE)
    # TODO(synk): Graph_Analysis('ae') relies on `Baselines.AE`, which is not defined in the
    # reference source; graphs are returned as `out` and rec = 0.
    out = graphs
    rec = jnp.zeros((1,), jnp.float32)
    return out, norm_l[0, 0], orth_l[0, 0], rec


if __name__ == "__main__":
    key = jax.random.PRNGKey(0)
    k1, k2 = jax.random.split(key)

    # nn.init.xavier_uniform_(patterns, gain=1.414)
    gain = 1.414
    bound = gain * math.sqrt(6.0 / (N_NODE + N_PAT))
    patterns = jax.random.uniform(k1, (N_PAT, N_NODE), jnp.float32, -bound, bound)

    x = jax.random.normal(k2, (B, N_NODE, T), dtype=jnp.float32)           # (B, N, T)
    length = jnp.array([32.0, 27.0], dtype=jnp.float32)

    out, norm_loss, orth_loss, rec = kpfbnc_forward(x, length, patterns)
    jax.block_until_ready((out, norm_loss, orth_loss, rec))
    print("KERNEL_OK")
</pallas_src>

<mosaic_0001>
module attributes {stable_mosaic.version = 11 : i64} {
  func.func @kpfbnc_kernel(%arg0: memref<2xf32, #tpu.memory_space<smem>>, %arg1: memref<32x16xf32, #tpu.memory_space<vmem>>, %arg2: memref<16x128xf32, #tpu.memory_space<vmem>>, %arg3: memref<32x16xf32, #tpu.memory_space<vmem>>, %arg4: memref<1x1xf32, #tpu.memory_space<smem>>, %arg5: memref<1x1xf32, #tpu.memory_space<smem>>) attributes {dimension_semantics = [], scalar_prefetch = 0 : i64, scratch_operands = 0 : i64, tpu.core_type = #tpu.core_type<tc>} {
    %c0 = arith.constant 0 : index
    %c0_0 = arith.constant 0 : index
    %0 = vector.load %arg1[%c0, %c0_0] : memref<32x16xf32, #tpu.memory_space<vmem>>, vector<32x16xf32>
    %1 = arith.mulf %0, %0 : vector<32x16xf32>
    %cst = arith.constant dense<0.000000e+00> : vector<32xf32>
    %2 = vector.multi_reduction <add>, %1, %cst [1] : vector<32x16xf32> to vector<32xf32>
    %3 = vector.shape_cast %2 : vector<32xf32> to vector<32x1xf32>
    %cst_1 = arith.constant 9.99999971E-10 : f32
    %4 = vector.broadcast %cst_1 : f32 to vector<32x1xf32>
    %5 = arith.addf %3, %4 : vector<32x1xf32>
    %6 = math.rsqrt %5 : vector<32x1xf32>
    %7 = vector.broadcast %6 : vector<32x1xf32> to vector<32x16xf32>
    %8 = arith.mulf %0, %7 : vector<32x16xf32>
    %9 = math.absf %8 : vector<32x16xf32>
    %10 = tpu.iota {dimensions = array<i32: 1>} : vector<32x16xi32>
    %cst_2 = arith.constant 0.000000e+00 : f32
    %11 = vector.broadcast %cst_2 : f32 to vector<32x16xf32>
    %cst_3 = arith.constant dense<0xFF800000> : vector<32xf32>
    %12 = vector.multi_reduction <maximumf>, %9, %cst_3 [1] : vector<32x16xf32> to vector<32xf32>
    %13 = vector.shape_cast %12 : vector<32xf32> to vector<32x1xf32>
    %14 = vector.broadcast %13 : vector<32x1xf32> to vector<32x16xf32>
    %15 = arith.cmpf oeq, %9, %14 : vector<32x16xf32>
    %c16_i32 = arith.constant 16 : i32
    %16 = vector.broadcast %c16_i32 : i32 to vector<32x16xi32>
    %17 = arith.select %15, %10, %16 : vector<32x16xi1>, vector<32x16xi32>
    %cst_4 = arith.constant dense<2147483647> : vector<32xi32>
    %18 = vector.multi_reduction <minsi>, %17, %cst_4 [1] : vector<32x16xi32> to vector<32xi32>
    %19 = vector.shape_cast %18 : vector<32xi32> to vector<32x1xi32>
    %20 = vector.broadcast %19 : vector<32x1xi32> to vector<32x16xi32>
    %21 = arith.cmpi eq, %10, %20 : vector<32x16xi32>
    %cst_5 = arith.constant 1.000000e+00 : f32
    %22 = vector.broadcast %cst_5 : f32 to vector<32x16xf32>
    %23 = arith.select %21, %22, %11 : vector<32x16xi1>, vector<32x16xf32>
    %cst_6 = arith.constant -1.000000e+00 : f32
    %24 = vector.broadcast %cst_6 : f32 to vector<32x16xf32>
    %25 = arith.select %21, %24, %9 : vector<32x16xi1>, vector<32x16xf32>
    %cst_7 = arith.constant dense<0xFF800000> : vector<32xf32>
    %26 = vector.multi_reduction <maximumf>, %25, %cst_7 [1] : vector<32x16xf32> to vector<32xf32>
    %27 = vector.shape_cast %26 : vector<32xf32> to vector<32x1xf32>
    %28 = vector.broadcast %27 : vector<32x1xf32> to vector<32x16xf32>
    %29 = arith.cmpf oeq, %25, %28 : vector<32x16xf32>
    %c16_i32_8 = arith.constant 16 : i32
    %30 = vector.broadcast %c16_i32_8 : i32 to vector<32x16xi32>
    %31 = arith.select %29, %10, %30 : vector<32x16xi1>, vector<32x16xi32>
    %cst_9 = arith.constant dense<2147483647> : vector<32xi32>
    %32 = vector.multi_reduction <minsi>, %31, %cst_9 [1] : vector<32x16xi32> to vector<32xi32>
    %33 = vector.shape_cast %32 : vector<32xi32> to vector<32x1xi32>
    %34 = vector.broadcast %33 : vector<32x1xi32> to vector<32x16xi32>
    %35 = arith.cmpi eq, %10, %34 : vector<32x16xi32>
    %cst_10 = arith.constant 1.000000e+00 : f32
    %36 = vector.broadcast %cst_10 : f32 to vector<32x16xf32>
    %37 = arith.select %35, %36, %23 : vector<32x16xi1>, vector<32x16xf32>
    %cst_11 = arith.constant -1.000000e+00 : f32
    %38 = vector.broadcast %cst_11 : f32 to vector<32x16xf32>
    %39 = arith.select %35, %38, %25 : vector<32x16xi1>, vector<32x16xf32>
    %cst_12 = arith.constant dense<0xFF800000> : vector<32xf32>
    %40 = vector.multi_reduction <maximumf>, %39, %cst_12 [1] : vector<32x16xf32> to vector<32xf32>
    %41 = vector.shape_cast %40 : vector<32xf32> to vector<32x1xf32>
    %42 = vector.broadcast %41 : vector<32x1xf32> to vector<32x16xf32>
    %43 = arith.cmpf oeq, %39, %42 : vector<32x16xf32>
    %c16_i32_13 = arith.constant 16 : i32
    %44 = vector.broadcast %c16_i32_13 : i32 to vector<32x16xi32>
    %45 = arith.select %43, %10, %44 : vector<32x16xi1>, vector<32x16xi32>
    %cst_14 = arith.constant dense<2147483647> : vector<32xi32>
    %46 = vector.multi_reduction <minsi>, %45, %cst_14 [1] : vector<32x16xi32> to vector<32xi32>
    %47 = vector.shape_cast %46 : vector<32xi32> to vector<32x1xi32>
    %48 = vector.broadcast %47 : vector<32x1xi32> to vector<32x16xi32>
    %49 = arith.cmpi eq, %10, %48 : vector<32x16xi32>
    %cst_15 = arith.constant 1.000000e+00 : f32
    %50 = vector.broadcast %cst_15 : f32 to vector<32x16xf32>
    %51 = arith.select %49, %50, %37 : vector<32x16xi1>, vector<32x16xf32>
    %52 = arith.mulf %51, %8 : vector<32x16xf32>
    %53 = math.sqrt %3 : vector<32x1xf32>
    %54 = arith.mulf %53, %6 : vector<32x1xf32>
    %55 = arith.mulf %52, %52 : vector<32x16xf32>
    %cst_16 = arith.constant dense<0.000000e+00> : vector<32xf32>
    %56 = vector.multi_reduction <add>, %55, %cst_16 [1] : vector<32x16xf32> to vector<32xf32>
    %57 = vector.shape_cast %56 : vector<32xf32> to vector<32x1xf32>
    %58 = math.sqrt %57 : vector<32x1xf32>
    %59 = arith.divf %58, %54 : vector<32x1xf32>
    %cst_17 = arith.constant 1.000000e+00 : f32
    %60 = vector.broadcast %cst_17 : f32 to vector<32x1xf32>
    %61 = arith.subf %60, %59 : vector<32x1xf32>
    %62 = arith.mulf %61, %61 : vector<32x1xf32>
    %63 = vector.shape_cast %62 : vector<32x1xf32> to vector<1x32x1xf32>
    %cst_18 = arith.constant dense<0.000000e+00> : vector<1xf32>
    %64 = vector.multi_reduction <add>, %63, %cst_18 [1, 2] : vector<1x32x1xf32> to vector<1xf32>
    %65 = vector.shape_cast %64 : vector<1xf32> to vector<1x1x1xf32>
    %66 = vector.extract %65[0, 0, 0] : f32 from vector<1x1x1xf32>
    %cst_19 = arith.constant 3.125000e-02 : f32
    %67 = arith.mulf %66, %cst_19 : f32
    %c0_20 = arith.constant 0 : index
    %c0_21 = arith.constant 0 : index
    %68 = memref.load %arg4[%c0_20, %c0_21] : memref<1x1xf32, #tpu.memory_space<smem>>
    memref.store %67, %arg4[%c0_20, %c0_21] : memref<1x1xf32, #tpu.memory_space<smem>>
    %c0_22 = arith.constant 0 : index
    %c0_23 = arith.constant 0 : index
    %69 = vector.load %arg2[%c0_22, %c0_23] : memref<16x128xf32, #tpu.memory_space<vmem>>, vector<16x128xf32>
    %70 = arith.mulf %69, %69 : vector<16x128xf32>
    %cst_24 = arith.constant dense<0.000000e+00> : vector<128xf32>
    %71 = vector.multi_reduction <add>, %70, %cst_24 [0] : vector<16x128xf32> to vector<128xf32>
    %72 = vector.shape_cast %71 : vector<128xf32> to vector<1x128xf32>
    %cst_25 = arith.constant 9.99999971E-10 : f32
    %73 = vector.broadcast %cst_25 : f32 to vector<1x128xf32>
    %74 = arith.addf %72, %73 : vector<1x128xf32>
    %75 = math.rsqrt %74 : vector<1x128xf32>
    %cst_26 = arith.constant dense<0.000000e+00> : vector<32x128xf32>
    %76 = tpu.matmul %8, %69, %cst_26 {dimension_numbers = #tpu.dot_dimension_numbers<[1], [0], [0], [1], [0, 0, 1, 1], [], []>} : vector<32x16xf32>, vector<16x128xf32>, vector<32x128xf32> -> vector<32x128xf32>
    %77 = vector.broadcast %75 : vector<1x128xf32> to vector<32x128xf32>
    %78 = arith.mulf %76, %77 : vector<32x128xf32>
    %79 = vector.extract_strided_slice %78 {offsets = [0, 64], sizes = [32, 32], strides = [1, 1]} : vector<32x128xf32> to vector<32x32xf32>
    %80 = tpu.iota {dimensions = array<i32: 0>} : vector<32x32xi32>
    %81 = tpu.iota {dimensions = array<i32: 1>} : vector<32x32xi32>
    %82 = arith.cmpi eq, %80, %81 : vector<32x32xi32>
    %cst_27 = arith.constant 0.000000e+00 : f32
    %83 = vector.broadcast %cst_27 : f32 to vector<32x32xf32>
    %84 = arith.select %82, %83, %79 : vector<32x32xi1>, vector<32x32xf32>
    %85 = math.absf %84 : vector<32x32xf32>
    %cst_28 = arith.constant 3.000000e-01 : f32
    %86 = vector.broadcast %cst_28 : f32 to vector<32x32xf32>
    %87 = arith.subf %85, %86 : vector<32x32xf32>
    %cst_29 = arith.constant 1.42855108 : f32
    %88 = vector.broadcast %cst_29 : f32 to vector<32x32xf32>
    %89 = arith.mulf %88, %87 : vector<32x32xf32>
    %cst_30 = arith.constant 0.000000e+00 : f32
    %90 = vector.broadcast %cst_30 : f32 to vector<32x32xf32>
    %91 = arith.maximumf %89, %90 : vector<32x32xf32>
    %92 = arith.mulf %91, %91 : vector<32x32xf32>
    %93 = vector.shape_cast %92 : vector<32x32xf32> to vector<1x32x32xf32>
    %cst_31 = arith.constant dense<0.000000e+00> : vector<1xf32>
    %94 = vector.multi_reduction <add>, %93, %cst_31 [1, 2] : vector<1x32x32xf32> to vector<1xf32>
    %95 = vector.shape_cast %94 : vector<1xf32> to vector<1x1x1xf32>
    %96 = vector.extract %95[0, 0, 0] : f32 from vector<1x1x1xf32>
    %cst_32 = arith.constant 9.765625E-4 : f32
    %97 = arith.mulf %96, %cst_32 : f32
    %c0_33 = arith.constant 0 : index
    %c0_34 = arith.constant 0 : index
    %98 = memref.load %arg5[%c0_33, %c0_34] : memref<1x1xf32, #tpu.memory_space<smem>>
    memref.store %97, %arg5[%c0_33, %c0_34] : memref<1x1xf32, #tpu.memory_space<smem>>
    %c127_i32 = arith.constant 127 : i32
    %99 = tpu.dynamic_rotate %78 by %c127_i32 dim 1 : vector<32x128xf32>, i32 -> vector<32x128xf32>
    %100 = arith.maximumf %78, %99 : vector<32x128xf32>
    %c127_i32_35 = arith.constant 127 : i32
    %101 = tpu.dynamic_rotate %78 by %c127_i32_35 dim 1 : vector<32x128xf32>, i32 -> vector<32x128xf32>
    %102 = arith.minimumf %78, %101 : vector<32x128xf32>
    %c126_i32 = arith.constant 126 : i32
    %103 = tpu.dynamic_rotate %100 by %c126_i32 dim 1 : vector<32x128xf32>, i32 -> vector<32x128xf32>
    %104 = arith.maximumf %100, %103 : vector<32x128xf32>
    %c126_i32_36 = arith.constant 126 : i32
    %105 = tpu.dynamic_rotate %102 by %c126_i32_36 dim 1 : vector<32x128xf32>, i32 -> vector<32x128xf32>
    %106 = arith.minimumf %102, %105 : vector<32x128xf32>
    %c124_i32 = arith.constant 124 : i32
    %107 = tpu.dynamic_rotate %104 by %c124_i32 dim 1 : vector<32x128xf32>, i32 -> vector<32x128xf32>
    %108 = arith.maximumf %104, %107 : vector<32x128xf32>
    %c124_i32_37 = arith.constant 124 : i32
    %109 = tpu.dynamic_rotate %106 by %c124_i32_37 dim 1 : vector<32x128xf32>, i32 -> vector<32x128xf32>
    %110 = arith.minimumf %106, %109 : vector<32x128xf32>
    %111 = tpu.iota {dimensions = array<i32: 1>} : vector<1x128xi32>
    %c7_i32 = arith.constant 7 : i32
    %112 = vector.broadcast %c7_i32 : i32 to vector<1x128xi32>
    %113 = arith.andi %111, %112 : vector<1x128xi32>
    %c0_i32 = arith.constant 0 : i32
    %114 = vector.broadcast %c0_i32 : i32 to vector<1x128xi32>
    %115 = arith.cmpi eq, %113, %114 : vector<1x128xi32>
    %116 = arith.subf %108, %110 : vector<32x128xf32>
    %cst_38 = arith.constant 0.000000e+00 : f32
    %117 = vector.shape_cast %115 : vector<1x128xi1> to vector<1x128xi1>
    %118 = vector.broadcast %117 : vector<1x128xi1> to vector<32x128xi1>
    %119 = vector.broadcast %cst_38 : f32 to vector<32x128xf32>
    %120 = arith.select %118, %116, %119 : vector<32x128xi1>, vector<32x128xf32>
    %121 = vector.extract_strided_slice %120 {offsets = [0, 0], sizes = [32, 32], strides = [1, 1]} : vector<32x128xf32> to vector<32x32xf32>
    %cst_39 = arith.constant dense<0.000000e+00> : vector<32xf32>
    %122 = vector.multi_reduction <add>, %121, %cst_39 [1] : vector<32x32xf32> to vector<32xf32>
    %123 = vector.shape_cast %122 : vector<32xf32> to vector<32x1xf32>
    %cst_40 = arith.constant 0.000000e+00 : f32
    %124 = vector.broadcast %cst_40 : f32 to vector<32x1xf32>
    %c0_41 = arith.constant 0 : index
    %125 = memref.load %arg0[%c0_41] : memref<2xf32, #tpu.memory_space<smem>>
    %126 = vector.broadcast %125 : f32 to vector<32x1xf32>
    %127 = arith.addf %124, %126 : vector<32x1xf32>
    %cst_42 = arith.constant 1.250000e-01 : f32
    %128 = vector.broadcast %cst_42 : f32 to vector<32x1xf32>
    %129 = arith.mulf %127, %128 : vector<32x1xf32>
    %130 = math.floor %129 : vector<32x1xf32>
    %cst_43 = arith.constant 5.000000e-01 : f32
    %131 = vector.broadcast %cst_43 : f32 to vector<32x1xf32>
    %132 = arith.mulf %123, %131 : vector<32x1xf32>
    %133 = arith.divf %132, %130 : vector<32x1xf32>
    %134 = vector.broadcast %133 : vector<32x1xf32> to vector<32x16xf32>
    %135 = arith.mulf %52, %134 : vector<32x16xf32>
    %136 = vector.extract_strided_slice %120 {offsets = [0, 32], sizes = [32, 32], strides = [1, 1]} : vector<32x128xf32> to vector<32x32xf32>
    %cst_44 = arith.constant dense<0.000000e+00> : vector<32xf32>
    %137 = vector.multi_reduction <add>, %136, %cst_44 [1] : vector<32x32xf32> to vector<32xf32>
    %138 = vector.shape_cast %137 : vector<32xf32> to vector<32x1xf32>
    %cst_45 = arith.constant 0.000000e+00 : f32
    %139 = vector.broadcast %cst_45 : f32 to vector<32x1xf32>
    %c1 = arith.constant 1 : index
    %140 = memref.load %arg0[%c1] : memref<2xf32, #tpu.memory_space<smem>>
    %141 = vector.broadcast %140 : f32 to vector<32x1xf32>
    %142 = arith.addf %139, %141 : vector<32x1xf32>
    %cst_46 = arith.constant 1.250000e-01 : f32
    %143 = vector.broadcast %cst_46 : f32 to vector<32x1xf32>
    %144 = arith.mulf %142, %143 : vector<32x1xf32>
    %145 = math.floor %144 : vector<32x1xf32>
    %cst_47 = arith.constant 5.000000e-01 : f32
    %146 = vector.broadcast %cst_47 : f32 to vector<32x1xf32>
    %147 = arith.mulf %138, %146 : vector<32x1xf32>
    %148 = arith.divf %147, %145 : vector<32x1xf32>
    %149 = vector.broadcast %148 : vector<32x1xf32> to vector<32x16xf32>
    %150 = arith.mulf %52, %149 : vector<32x16xf32>
    %151 = tpu.concatenate %135, %150 in 1 : vector<32x16xf32>, vector<32x16xf32> -> vector<32x32xf32>
    %cst_48 = arith.constant dense<0.000000e+00> : vector<32x16xf32>
    %152 = tpu.matmul %151, %52, %cst_48 {dimension_numbers = #tpu.dot_dimension_numbers<[0], [0], [1], [1], [0, 1, 1, 1], [], []>} : vector<32x32xf32>, vector<32x16xf32>, vector<32x16xf32> -> vector<32x16xf32>
    %153 = tpu.iota {dimensions = array<i32: 0>} : vector<16x16xi32>
    %154 = tpu.iota {dimensions = array<i32: 1>} : vector<16x16xi32>
    %155 = arith.cmpi eq, %153, %154 : vector<16x16xi32>
    %cst_49 = arith.constant 1.000000e+00 : f32
    %cst_50 = arith.constant 6.000000e+00 : f32
    %156 = vector.broadcast %cst_49 : f32 to vector<16x16xf32>
    %157 = vector.broadcast %cst_50 : f32 to vector<16x16xf32>
    %158 = arith.select %155, %156, %157 : vector<16x16xi1>, vector<16x16xf32>
    %159 = tpu.concatenate %158, %158 in 0 : vector<16x16xf32>, vector<16x16xf32> -> vector<32x16xf32>
    %160 = arith.mulf %152, %159 : vector<32x16xf32>
    %c0_51 = arith.constant 0 : index
    %c0_52 = arith.constant 0 : index
    %161 = vector.load %arg3[%c0_51, %c0_52] : memref<32x16xf32, #tpu.memory_space<vmem>>, vector<32x16xf32>
    tpu.vector_store %arg3[%c0_51, %c0_52], %160 {strides = array<i32>} : memref<32x16xf32, #tpu.memory_space<vmem>>, vector<32x16xf32>,
    return
  }
}

</mosaic_0001>

<bundles_post_ra>
// kernel: kpfbnc_forward.1
= control target key start
LH: loop header
LB: loop body
LE: loop exit
PB: predicated region body
PF: predicated region fallthrough
CT: control target
= control target key end

     0   :  { %11 = vsyncpa [#allocation5], 0  ;;  %s1906_s0 = inlined_call_operand.vmem [shape: f32[2], index: 0, kind: input, shape index: {}]   ;;  %s1907_s1 = inlined_call_operand.vmem [shape: f32[32,16], index: 1, kind: input, shape index: {}]   ;;  %s1908_s2 = inlined_call_operand.vmem [shape: f32[16,128], index: 2, kind: input, shape index: {}]   ;;  %s1909_s3 = inlined_call_operand.hbm [shape: f32[32,16], index: 3, kind: output, shape index: {0}]   ;;  %s1910_s4 = inlined_call_operand.hbm [shape: f32[1,1], index: 4, kind: output, shape index: {1}]   ;;  %s1911_s5 = inlined_call_operand.hbm [shape: f32[1,1], index: 5, kind: output, shape index: {2}]  }
   0x1   :  { %12 = vsyncpa [#allocation3], 0 }
   0x2   :  { %13 = vsyncpa [#allocation4], 0 }
   0x3   :  { %14 = vsyncpa [#allocation9], 0  ;;  %s20_s20 = sshll.u32 %s1906_s0, 4  ;;  %s1196_s21 = smov [#allocation2]   ;;  %s21_s20 = int_to_ptr.vmem [resolvable:$true] %s20_s20 }
   0x4   :  { %23 = dma.vmem_to_smem %s21_s20, 16, %s1196_s21, [#allocation5]  }
   0x5   :  { %1188 = dma.done.wait [#allocation5], 16  }
   0x6   :  { %1189 = vsyncadd [#allocation5], 4294967280 }
   0x7   :  { %32 = sfence }
   0x8   :  { %v1246_v0 = vld [vmem:[%s1907_s1 + $0x10] sm:$0xff]  ;;  %vm41_vm0 = vcmask 130048   ;;  %v1251_v1 = vld [vmem:[%s1907_s1] sm:$0xff]  ;;  %v1260_v4 = vld [vmem:[%s1907_s1 + $0x18] sm:$0xff]  ;;  %s1198_s7 = smov 126   ;;  %s1200_s8 = smov 124  }
   0x9   :  { %v39_v2 = vmul.f32 %v1246_v0, %v1246_v0  ;;  %v37_v3 = vmul.f32 %v1251_v1, %v1251_v1  ;;  %v1265_v5 = vld [vmem:[%s1907_s1 + $0x8] sm:$0xff]  ;;  %v40_v8 = vmul.f32 %v1260_v4, %v1260_v4  ;;  %v588_v14 = vld [vmem:[%s1908_s2] sm:$0xff]  ;;  %s1201_s9 = smov 96   ;;  %s1061_s10 = sld [smem:[#allocation2 + $0x1]] }
   0xa   :  { %v38_v9 = vmul.f32 %v1265_v5, %v1265_v5  ;;  %v589_v12 = vld [vmem:[%s1908_s2 + $0x8] sm:$0xff]  ;;  %v590_v15 = vmul.f32 %v588_v14, %v588_v14  ;;  %s1197_s2 = smov 127   ;;  %s1202_s11 = smov 16  }
   0xb   :  { %v48_v6 = vsel %vm41_vm0, %v39_v2, 0.0  ;;  %v42_v7 = vsel %vm41_vm0, %v37_v3, 0.0  ;;  %v51_v10 = vsel %vm41_vm0, %v40_v8, 0.0  ;;  %636 = vmatpush.msra.mxu0 %v589_v12  ;;  %1066 = vmatpush.msra.mxu3 %v589_v12  ;;  %v591_v13 = vmul.f32 %v589_v12, %v589_v12  ;;  %s812_s12 = sld [smem:[#allocation2]]  ;;  %s1203_s13 = smov 64  }
   0xc   :  { %49 = vadd.xlane.f32.xlu1 %v48_v6  ;;  %43 = vadd.xlane.f32.xlu0 %v42_v7  ;;  %v45_v11 = vsel %vm41_vm0, %v38_v9, 0.0  ;;  %s1023_s16 = sshll.u32 %s1910_s4, 4  ;;  %s1032_s20 = sshll.u32 %s1911_s5, 4  ;;  %s1024_s16 = int_to_ptr.hbm [resolvable:$true] %s1023_s16  ;;  %s1033_s20 = int_to_ptr.hbm [resolvable:$true] %s1032_s20 }
   0xd   :  { %637 = vmatpush.msra.mxu0 %v588_v14  ;;  %1067 = vmatpush.msra.mxu3 %v588_v14  ;;  %v1281_v16 = vadd.f32 %v591_v13, %v590_v15  ;;  %s1204_s24 = smov [#allocation7]   ;;  %s1205_s25 = smov [#allocation8]  }
   0xe   :  { %s1207_s4 = smov [#allocation6]   ;;  %s1011_s27 = sshll.u32 %s1909_s3, 4  ;;  %s1012_s27 = int_to_ptr.hbm [resolvable:$true] %s1011_s27 }
   0xf   :  { %s1009_s5 = sshll.u32 %s1207_s4, 4  ;;  %s1208_s28 = smov 128   ;;  %s1010_s5 = int_to_ptr.vmem [resolvable:$true] %s1009_s5 }
  0x10   :  { %s1209_s1 = smov 8  }
  0x14   :  { %52 = vadd.xlane.f32.xlu1 %v51_v10  ;;  %46 = vadd.xlane.f32.xlu0 %v45_v11 }
  0x7f   :  { %v1283_v17 = vpop.xlane.xlu1 %49  ;;  %v1285_v18 = vpop.xlane.xlu0 %43 }
  0x80   :  { %1090 = vrsqrt.f32 %v1283_v17  ;;  %v54_v19 = vadd.f32 1e-09, %v1285_v18  ;;  %v56_v20 = vadd.f32 1e-09, %v1283_v17  ;;  %vm391_vm1 = vcmp.eq.f32.partialorder %v1285_v18, inf }
  0x81   :  { %1092 = vrsqrt.f32 %v1285_v18  ;;  %vm393_vm2 = vcmp.eq.f32.partialorder %v1285_v18, 0.0  ;;  %v394_v44 = vand.u32 2147483648, %v1285_v18  ;;  %vm415_vm6 = vcmp.eq.f32.partialorder %v1283_v17, inf }
  0x82   :  { %1094 = vrsqrt.f32 %v54_v19  ;;  %vm64_vm4 = vweird.f32 %v54_v19  ;;  %vm84_vm8 = vweird.f32 %v56_v20  ;;  %v418_v54 = vand.u32 2147483648, %v1283_v17 }
  0x83   :  { %1096 = vrsqrt.f32 %v56_v20  ;;  %vm417_vm10 = vcmp.eq.f32.partialorder %v1283_v17, 0.0 }
  0x86   :  { %v1091_v21 = vpop.eup %1090 }
  0x87   :  { %v1093_v22 = vpop.eup %1092  ;;  %v409_v23 = vmul.f32 %v1091_v21, %v1283_v17  ;;  %v1292_v24 = vpop.xlane.xlu0 %46 }
  0x88   :  { %v1095_v25 = vpop.eup %1094  ;;  %v385_v26 = vmul.f32 %v1093_v22, %v1285_v18  ;;  %v1296_v27 = vadd.f32 1e-09, %v1292_v24  ;;  %v1298_v30 = vpop.xlane.xlu1 %52 }
  0x89   :  { %v1097_v28 = vpop.eup %1096  ;;  %v410_v29 = vmul.f32 %v1091_v21, %v409_v23  ;;  %v59_v31 = vmul.f32 %v1095_v25, %v54_v19  ;;  %v1302_v38 = vadd.f32 1e-09, %v1298_v30  ;;  %vm65_vm3 = vweird.f32 %v1095_v25 }
  0x8a   :  { %v386_v32 = vmul.f32 %v1093_v22, %v385_v26  ;;  %v79_v33 = vmul.f32 %v1097_v28, %v56_v20  ;;  %1098 = vrsqrt.f32 %v1296_v27  ;;  %vm85_vm5 = vweird.f32 %v1097_v28  ;;  %vm66_vm7 = vmor %vm64_vm4, %vm65_vm3 }
  0x8b   :  { %v411_v34 = vmul.f32 0.5, %v410_v29  ;;  %v60_v35 = vmul.f32 %v1095_v25, %v59_v31  ;;  %1100 = vrsqrt.f32 %v1302_v38  ;;  %vm86_vm9 = vmor %vm84_vm8, %vm85_vm5  ;;  %vm74_vm12 = vweird.f32 %v1296_v27 }
  0x8c   :  { %v387_v36 = vmul.f32 0.5, %v386_v32  ;;  %v80_v37 = vmul.f32 %v1097_v28, %v79_v33  ;;  %vm94_vm15 = vweird.f32 %v1302_v38  ;;  %v593_v26 = vrot.slane %v1281_v16, 4 }
  0x8d   :  { %v412_v39 = vsub.f32 1.5, %v411_v34  ;;  %v61_v40 = vmul.f32 0.5, %v60_v35  ;;  %v106_v32 = vlaneseq }
  0x8e   :  { %v388_v41 = vsub.f32 1.5, %v387_v36  ;;  %v81_v42 = vmul.f32 0.5, %v80_v37 }
  0x8f   :  { %v62_v43 = vsub.f32 1.5, %v61_v40  ;;  %v413_v45 = vmul.f32 %v1091_v21, %v412_v39  ;;  %v1376_v33 = vand.u32 127, %v106_v32 }
  0x90   :  { %v1099_v46 = vpop.eup %1098  ;;  %v389_v47 = vmul.f32 %v1093_v22, %v388_v41  ;;  %v82_v48 = vsub.f32 1.5, %v81_v42 }
  0x91   :  { %v63_v49 = vmul.f32 %v1095_v25, %v62_v43  ;;  %v414_v50 = vmul.f32 %v413_v45, %v1283_v17  ;;  %v69_v51 = vmul.f32 %v1099_v46, %v1296_v27  ;;  %v1101_v58 = vpop.eup %1100  ;;  %vm75_vm11 = vweird.f32 %v1099_v46 }
  0x92   :  { %v390_v52 = vmul.f32 %v389_v47, %v1285_v18  ;;  %v83_v53 = vmul.f32 %v1097_v28, %v82_v48  ;;  %v89_v9 = vmul.f32 %v1101_v58, %v1302_v38  ;;  %vm76_vm13 = vmor %vm74_vm12, %vm75_vm11  ;;  %vm95_vm14 = vweird.f32 %v1101_v58 }
  0x93   :  { %v67_v55 = vsel %vm66_vm7, %v1095_v25, %v63_v49  ;;  %v416_v56 = vsel %vm415_vm6, %v1283_v17, %v414_v50  ;;  %v70_v57 = vmul.f32 %v1099_v46, %v69_v51  ;;  %v594_v27 = vadd.f32 %v593_v26, %v1281_v16 }
  0x94   :  { %v1316_v59 = vmul.f32 %v67_v55, %v1251_v1  ;;  %v392_v60 = vsel %vm391_vm1, %v1285_v18, %v390_v52  ;;  %v87_v61 = vsel %vm86_vm9, %v1097_v28, %v83_v53  ;;  %v419_v62 = vsel %vm417_vm10, %v418_v54, %v416_v56  ;;  %vm96_vm1 = vmor %vm94_vm15, %vm95_vm14 }
  0x95   :  { %v395_v63 = vsel %vm393_vm2, %v394_v44, %v392_v60  ;;  %v1324_v2 = vmul.f32 %v87_v61, %v1246_v0  ;;  %v1326_v3 = vmul.f32 %v419_v62, %v87_v61  ;;  %v71_v7 = vmul.f32 0.5, %v70_v57 }
  0x96   :  { %v1328_v6 = vmul.f32 %v395_v63, %v67_v55  ;;  %1053 = vmatmul.msk.f32.vlgmr.msra.gmra.mxu0 %vm41_vm0, %v1316_v59  ;;  %v1333_v1 = vand.u32 2147483647, %v1316_v59  ;;  %v90_v12 = vmul.f32 %v1101_v58, %v89_v9 }
  0x97   :  { %v1336_v8 = vand.u32 2147483647, %v1324_v2  ;;  %v72_v10 = vsub.f32 1.5, %v71_v7 }
  0x98   :  { %v108_v0 = vsel %vm41_vm0, %v1333_v1, -inf  ;;  %v91_v14 = vmul.f32 0.5, %v90_v12 }
  0x99   :  { %v114_v11 = vsel %vm41_vm0, %v1336_v8, -inf  ;;  %109 = vmax.xlane.f32.xlu2 %v108_v0  ;;  %v73_v13 = vmul.f32 %v1099_v46, %v72_v10 }
  0x9a   :  { %115 = vmax.xlane.f32.xlu0 %v114_v11  ;;  %v92_v18 = vsub.f32 1.5, %v91_v14 }
  0x9b   :  { %v1344_v15 = vsel %vm76_vm13, %v1099_v46, %v73_v13 }
  0x9c   :  { %v1348_v17 = vmul.f32 %v1344_v15, %v1265_v5  ;;  %v93_v19 = vmul.f32 %v1101_v58, %v92_v18 }
  0x9e   :  { %1054 = vmatmul.msk.f32.vlgmr.msra.gmra.mxu3 %vm41_vm0, %v1348_v17  ;;  %v1354_v20 = vand.u32 2147483647, %v1348_v17  ;;  %v1356_v21 = vsel %vm96_vm1, %v1101_v58, %v93_v19 }
  0x9f   :  { %v1362_v5 = vmul.f32 %v1356_v21, %v1260_v4  ;;  %v595_v4 = vrot.slane %v594_v27, 2 }
  0xa0   :  { %v111_v22 = vsel %vm41_vm0, %v1354_v20, -inf }
  0xa1   :  { %112 = vmax.xlane.f32.xlu2 %v111_v22  ;;  %v1365_v23 = vand.u32 2147483647, %v1362_v5  ;;  %v596_v28 = vadd.f32 %v595_v4, %v594_v27 }
  0xa3   :  { %v117_v25 = vsel %vm41_vm0, %v1365_v23, -inf  ;;  %v597_v29 = vrot.slane %v596_v28, 1 }
  0xa4   :  { %118 = vmax.xlane.f32.xlu1 %v117_v25 }
  0xa5   :  { %v598_v31 = vadd.f32 %v597_v29, %v596_v28 }
  0xa6   :  { %1055 = vmatmul.msk.f32.gmra.mxu3 %vm41_vm0, %v1324_v2 }
  0xa7   :  { %v599_v34 = vadd.f32 1e-09, %v598_v31 }
  0xa9   :  { %1102 = vrsqrt.f32 %v599_v34  ;;  %vm606_vm6 = vweird.f32 %v599_v34 }
  0xae   :  { %1056 = vmatmul.msk.f32.gmra.mxu3 %vm41_vm0, %v1362_v5 }
  0xaf   :  { %v1103_v44 = vpop.eup %1102 }
  0xb0   :  { %v601_v46 = vmul.f32 %v1103_v44, %v599_v34  ;;  %vm607_vm7 = vweird.f32 %v1103_v44 }
  0xb1   :  { %vm608_vm8 = vmor %vm606_vm6, %vm607_vm7 }
  0xb2   :  { %v602_v51 = vmul.f32 %v1103_v44, %v601_v46 }
  0xb4   :  { %v603_v56 = vmul.f32 0.5, %v602_v51 }
  0xb6   :  { %v604_v60 = vsub.f32 1.5, %v603_v56 }
  0xb8   :  { %v605_v61 = vmul.f32 %v1103_v44, %v604_v60 }
  0xba   :  { %v609_v63 = vsel %vm608_vm8, %v1103_v44, %v605_v61 }
 0x10c   :  { %v110_v35 = vpop.xlane.xlu2 %109 }
 0x10d   :  { %vm120_vm2 = vcmp.eq.f32.partialorder %v1333_v1, %v110_v35  ;;  %v116_v36 = vpop.xlane.xlu0 %115 }
 0x10e   :  { %v124_v37 = vsel %vm120_vm2, %v1376_v33, 16  ;;  %vm122_vm3 = vcmp.eq.f32.partialorder %v1336_v8, %v116_v36 }
 0x10f   :  { %v128_v16 = vsel %vm41_vm0, %v124_v37, 2147483647  ;;  %v126_v38 = vsel %vm122_vm3, %v1376_v33, 16 }
 0x110   :  { %v158_v39 = vsel %vm41_vm0, %v126_v38, 2147483647  ;;  %v130_v40 = vshra.s32 %v128_v16, 16  ;;  %v129_v13 = vand.u32 65535, %v128_v16 }
 0x111   :  { %v160_v41 = vshra.s32 %v158_v39, 16  ;;  %v159_v14 = vand.u32 65535, %v158_v39 }
 0x112   :  { %v132_v42 = vcvt.s32.f32 %v130_v40  ;;  %v131_v19 = vcvt.s32.f32 %v129_v13 }
 0x113   :  { %v162_v43 = vcvt.s32.f32 %v160_v41  ;;  %v639_v7 = vpop.f32.mrf.mxu0  ;;  %v161_v25 = vcvt.s32.f32 %v159_v14 }
 0x114   :  { %133 = vmin.xlane.f32.xlu2 %v132_v42  ;;  %v113_v45 = vpop.xlane.xlu2 %112  ;;  %v1393_v0 = vmul.f32 %v639_v7, %v609_v63 }
 0x115   :  { %163 = vmin.xlane.f32.xlu1 %v162_v43  ;;  %vm121_vm4 = vcmp.eq.f32.partialorder %v1354_v20, %v113_v45 }
 0x116   :  { %v125_v47 = vsel %vm121_vm4, %v1376_v33, 16 }
 0x117   :  { %v143_v48 = vsel %vm41_vm0, %v125_v47, 2147483647  ;;  %v119_v50 = vpop.xlane.xlu1 %118 }
 0x118   :  { %v145_v49 = vshra.s32 %v143_v48, 16  ;;  %vm123_vm5 = vcmp.eq.f32.partialorder %v1365_v23, %v119_v50  ;;  %v144_v4 = vand.u32 65535, %v143_v48 }
 0x119   :  { %v127_v53 = vsel %vm123_vm5, %v1376_v33, 16 }
 0x11a   :  { %v147_v52 = vcvt.s32.f32 %v145_v49  ;;  %v173_v54 = vsel %vm41_vm0, %v127_v53, 2147483647  ;;  %v146_v29 = vcvt.s32.f32 %v144_v4 }
 0x11b   :  { %v175_v55 = vshra.s32 %v173_v54, 16  ;;  %v174_v31 = vand.u32 65535, %v173_v54 }
 0x11c   :  { %148 = vmin.xlane.f32.xlu0 %v147_v52 }
 0x11d   :  { %v177_v57 = vcvt.s32.f32 %v175_v55  ;;  %v176_v36 = vcvt.s32.f32 %v174_v31  ;;  %v1199_v55 = vmov 0.0  }
 0x11f   :  { %178 = vmin.xlane.f32.xlu2 %v177_v57 }
 0x121   :  { %v642_v58 = vpop.f32.mrf.mxu3 }
 0x122   :  { %v1390_v9 = vmul.f32 %v642_v58, %v609_v63 }
 0x129   :  { %v645_v62 = vpop.f32.mrf.mxu3 }
 0x12a   :  { %v1398_v12 = vmul.f32 %v645_v62, %v609_v63 }
 0x12e   :  { %726 = vrot.lane.b32.xlu1 %v1390_v9, %s1197_s2 }
 0x130   :  { %724 = vrot.lane.b32.xlu0 %v1393_v0, %s1197_s2 }
 0x131   :  { %v648_v10 = vpop.f32.mrf.mxu3 }
 0x132   :  { %v1396_v11 = vmul.f32 %v648_v10, %v609_v63 }
 0x137   :  { %728 = vrot.lane.b32.xlu2 %v1398_v12, %s1197_s2 }
 0x138   :  { %730 = vrot.lane.b32.xlu0 %v1396_v11, %s1197_s2 }
 0x187   :  { %v1402_v18 = vpop.xlane.xlu2 %133 }
 0x188   :  { %v164_v22 = vpop.xlane.xlu1 %163  ;;  %vm135_vm9 = vcmp.eq.f32.partialorder %v132_v42, %v1402_v18 }
 0x189   :  { %v136_v26 = vsel %vm135_vm9, %v131_v19, inf  ;;  %vm165_vm10 = vcmp.eq.f32.partialorder %v162_v43, %v164_v22  ;;  %v170_v49 = vcvt.f32.s32 %v164_v22 }
 0x18a   :  { %137 = vmin.xlane.f32.xlu0 %v136_v26  ;;  %v166_v27 = vsel %vm165_vm10, %v161_v25, inf }
 0x18b   :  { %167 = vmin.xlane.f32.xlu2 %v166_v27  ;;  %v171_v51 = vshll.u32 %v170_v49, 16 }
 0x18f   :  { %v149_v28 = vpop.xlane.xlu0 %148 }
 0x190   :  { %vm150_vm11 = vcmp.eq.f32.partialorder %v147_v52, %v149_v28  ;;  %v155_v54 = vcvt.f32.s32 %v149_v28 }
 0x191   :  { %v151_v34 = vsel %vm150_vm11, %v146_v29, inf }
 0x192   :  { %152 = vmin.xlane.f32.xlu1 %v151_v34  ;;  %v179_v35 = vpop.xlane.xlu2 %178  ;;  %v156_v58 = vshll.u32 %v155_v54, 16 }
 0x193   :  { %vm180_vm12 = vcmp.eq.f32.partialorder %v177_v57, %v179_v35  ;;  %v185_v29 = vcvt.f32.s32 %v179_v35 }
 0x194   :  { %v181_v37 = vsel %vm180_vm12, %v176_v36, inf }
 0x195   :  { %182 = vmin.xlane.f32.xlu0 %v181_v37  ;;  %v186_v34 = vshll.u32 %v185_v29, 16 }
 0x19a   :  { %v729_v40 = vpop.permute.xlu2 %728 }
 0x19b   :  { %v1408_v42 = vmin.f32 %v1398_v12, %v729_v40  ;;  %v1413_v44 = vmax.f32 %v1398_v12, %v729_v40 }
 0x1a0   :  { %v727_v16 = vpop.permute.xlu1 %726 }
 0x1a1   :  { %v733_v38 = vmax.f32 %v1390_v9, %v727_v16  ;;  %v737_v45 = vmin.f32 %v1390_v9, %v727_v16 }
 0x1a2   :  { %v725_v39 = vpop.permute.xlu0 %724 }
 0x1a3   :  { %742 = vrot.lane.b32.xlu2 %v733_v38, %s1198_s7  ;;  %v736_v41 = vmin.f32 %v1393_v0, %v725_v39  ;;  %v732_v43 = vmax.f32 %v1393_v0, %v725_v39 }
 0x1a9   :  { %752 = vrot.lane.b32.xlu0 %v736_v41, %s1198_s7 }
 0x1aa   :  { %v731_v46 = vpop.permute.xlu0 %730 }
 0x1ab   :  { %756 = vrot.lane.b32.xlu2 %v1408_v42, %s1198_s7  ;;  %740 = vrot.lane.b32.xlu1 %v732_v43, %s1198_s7  ;;  %v1418_v47 = vmax.f32 %v1396_v11, %v731_v46  ;;  %v1421_v48 = vmin.f32 %v1396_v11, %v731_v46 }
 0x1b1   :  { %754 = vrot.lane.b32.xlu0 %v737_v45, %s1198_s7 }
 0x1b3   :  { %744 = vrot.lane.b32.xlu1 %v1413_v44, %s1198_s7 }
 0x1b9   :  { %746 = vrot.lane.b32.xlu0 %v1418_v47, %s1198_s7 }
 0x1bb   :  { %758 = vrot.lane.b32.xlu1 %v1421_v48, %s1198_s7 }
 0x1fd   :  { %v138_v62 = vpop.xlane.xlu0 %137 }
 0x1fe   :  { %v168_v50 = vpop.xlane.xlu2 %167  ;;  %v139_v27 = vcvt.f32.s32 %v138_v62 }
 0x1ff   :  { %v169_v52 = vcvt.f32.s32 %v168_v50 }
 0x201   :  { %v172_v53 = vadd.s32 %v171_v51, %v169_v52 }
 0x203   :  { %vm190_vm13 = vcmp.eq.s32.totalorder %v1376_v33, %v172_v53 }
 0x204   :  { %v1429_v56 = vsel %vm190_vm13, 1.0, %v1199_v55 }
 0x205   :  { %v153_v57 = vpop.xlane.xlu1 %152 }
 0x206   :  { %v154_v60 = vcvt.f32.s32 %v153_v57  ;;  %v743_v25 = vpop.permute.xlu2 %742 }
 0x207   :  { %v1445_v26 = vmax.f32 %v733_v38, %v743_v25 }
 0x208   :  { %v1431_v61 = vadd.s32 %v156_v58, %v154_v60  ;;  %v183_v10 = vpop.xlane.xlu0 %182 }
 0x209   :  { %v184_v31 = vcvt.f32.s32 %v183_v10 }
 0x20a   :  { %vm189_vm14 = vcmp.eq.s32.totalorder %v1376_v33, %v1431_v61 }
 0x20b   :  { %v1439_v63 = vsel %vm189_vm14, -1.0, %v1354_v20  ;;  %v140_v20 = vcvt.f32.s32 %v1402_v18  ;;  %v1463_v18 = vsel %vm190_vm13, -1.0, %v1336_v8  ;;  %v1465_v37 = vadd.s32 %v186_v34, %v184_v31 }
 0x20c   :  { %v203_v7 = vsel %vm41_vm0, %v1439_v63, -inf  ;;  %v206_v16 = vsel %vm41_vm0, %v1463_v18, -inf }
 0x20d   :  { %204 = vmax.xlane.f32.xlu2 %v203_v7  ;;  %v141_v4 = vshll.u32 %v140_v20, 16  ;;  %vm191_vm1 = vcmp.eq.s32.totalorder %v1376_v33, %v1465_v37 }
 0x20e   :  { %v757_v40 = vpop.permute.xlu2 %756 }
 0x20f   :  { %v1450_v28 = vadd.s32 %v141_v4, %v139_v27 }
 0x211   :  { %vm188_vm15 = vcmp.eq.s32.totalorder %v1376_v33, %v1450_v28 }
 0x212   :  { %v1458_v36 = vsel %vm188_vm15, -1.0, %v1333_v1  ;;  %v1477_v1 = vsel %vm191_vm1, -1.0, %v1365_v23 }
 0x213   :  { %v200_v35 = vsel %vm41_vm0, %v1458_v36, -inf  ;;  %v209_v8 = vsel %vm41_vm0, %v1477_v1, -inf }
 0x21b   :  { %v753_v13 = vpop.permute.xlu0 %752 }
 0x21c   :  { %v760_v19 = vmin.f32 %v736_v41, %v753_v13  ;;  %v1486_v41 = vmin.f32 %v1408_v42, %v757_v40 }
 0x21d   :  { %v741_v14 = vpop.permute.xlu1 %740 }
 0x21e   :  { %v748_v22 = vmax.f32 %v732_v43, %v741_v14  ;;  %776 = vrot.lane.b32.xlu1 %v760_v19, %s1200_s8 }
 0x220   :  { %764 = vrot.lane.b32.xlu0 %v748_v22, %s1200_s8 }
 0x223   :  { %v755_v38 = vpop.permute.xlu0 %754 }
 0x224   :  { %v1481_v39 = vmin.f32 %v737_v45, %v755_v38 }
 0x225   :  { %766 = vrot.lane.b32.xlu2 %v1445_v26, %s1200_s8  ;;  %v745_v43 = vpop.permute.xlu1 %744 }
 0x226   :  { %v1491_v23 = vmax.f32 %v1413_v44, %v745_v43  ;;  %v788_v44 = vand.u32 7, %v1376_v33 }
 0x228   :  { %vm1499_vm3 = vcmp.eq.s32.totalorder %v788_v44, 0 }
 0x22b   :  { %v747_v51 = vpop.permute.xlu0 %746 }
 0x22c   :  { %v751_v38 = vmax.f32 %v1418_v47, %v747_v51 }
 0x22d   :  { %v759_v52 = vpop.permute.xlu1 %758 }
 0x248   :  { %201 = vmax.xlane.f32.xlu1 %v200_v35 }
 0x24a   :  { %207 = vmax.xlane.f32.xlu0 %v206_v16 }
 0x250   :  { %210 = vmax.xlane.f32.xlu1 %v209_v8 }
 0x25e   :  { %778 = vrot.lane.b32.xlu0 %v1481_v39, %s1200_s8 }
 0x266   :  { %780 = vrot.lane.b32.xlu0 %v1486_v41, %s1200_s8 }
 0x269   :  { %768 = vrot.lane.b32.xlu1 %v1491_v23, %s1200_s8 }
 0x280   :  { %v205_v46 = vpop.xlane.xlu2 %204 }
 0x281   :  { %vm213_vm2 = vcmp.eq.f32.partialorder %v1439_v63, %v205_v46 }
 0x282   :  { %v217_v45 = vsel %vm213_vm2, %v1376_v33, 16 }
 0x283   :  { %v235_v49 = vsel %vm41_vm0, %v217_v45, 2147483647 }
 0x284   :  { %v237_v50 = vshra.s32 %v235_v49, 16  ;;  %v236_v46 = vand.u32 65535, %v235_v49 }
 0x286   :  { %v239_v42 = vcvt.s32.f32 %v237_v50  ;;  %v238_v50 = vcvt.s32.f32 %v236_v46 }
 0x290   :  { %240 = vmin.xlane.f32.xlu0 %v239_v42  ;;  %v777_v54 = vpop.permute.xlu1 %776 }
 0x291   :  { %v784_v58 = vmin.f32 %v760_v19, %v777_v54  ;;  %v763_v54 = vmin.f32 %v1421_v48, %v759_v52 }
 0x292   :  { %v765_v53 = vpop.permute.xlu0 %764 }
 0x293   :  { %v772_v57 = vmax.f32 %v748_v22, %v765_v53 }
 0x295   :  { %v790_v60 = vsub.f32 %v772_v57, %v784_v58  ;;  %v1526_v57 = vpop.permute.xlu2 %766 }
 0x297   :  { %v1505_v7 = vsel %vm1499_vm3, %v790_v60, 0.0 }
 0x2a4   :  { %847 = vrot.lane.b32.xlu0 %v1505_v7, %s1201_s9 }
 0x2bb   :  { %v202_v10 = vpop.xlane.xlu1 %201 }
 0x2bc   :  { %vm212_vm4 = vcmp.eq.f32.partialorder %v1458_v36, %v202_v10 }
 0x2bd   :  { %v208_v13 = vpop.xlane.xlu0 %207  ;;  %v216_v14 = vsel %vm212_vm4, %v1376_v33, 16 }
 0x2be   :  { %vm214_vm5 = vcmp.eq.f32.partialorder %v1463_v18, %v208_v13  ;;  %v220_v22 = vsel %vm41_vm0, %v216_v14, 2147483647 }
 0x2bf   :  { %v218_v19 = vsel %vm214_vm5, %v1376_v33, 16  ;;  %v222_v20 = vshra.s32 %v220_v22, 16  ;;  %v221_v47 = vand.u32 65535, %v220_v22 }
 0x2c0   :  { %v250_v25 = vsel %vm41_vm0, %v218_v19, 2147483647 }
 0x2c1   :  { %v252_v27 = vshra.s32 %v250_v25, 16  ;;  %v224_v4 = vcvt.s32.f32 %v222_v20  ;;  %v251_v51 = vand.u32 65535, %v250_v25  ;;  %v223_v60 = vcvt.s32.f32 %v221_v47 }
 0x2c3   :  { %v254_v29 = vcvt.s32.f32 %v252_v27  ;;  %225 = vmin.xlane.f32.xlu2 %v224_v4  ;;  %v211_v31 = vpop.xlane.xlu1 %210  ;;  %v253_v13 = vcvt.s32.f32 %v251_v51 }
 0x2c4   :  { %vm215_vm6 = vcmp.eq.f32.partialorder %v1477_v1, %v211_v31 }
 0x2c5   :  { %255 = vmin.xlane.f32.xlu1 %v254_v29  ;;  %v219_v34 = vsel %vm215_vm6, %v1376_v33, 16 }
 0x2c6   :  { %v265_v35 = vsel %vm41_vm0, %v219_v34, 2147483647 }
 0x2c7   :  { %v267_v16 = vshra.s32 %v265_v35, 16  ;;  %v266_v14 = vand.u32 65535, %v265_v35 }
 0x2c9   :  { %v269_v8 = vcvt.s32.f32 %v267_v16  ;;  %v268_v52 = vcvt.s32.f32 %v266_v14 }
 0x2cb   :  { %270 = vmin.xlane.f32.xlu2 %v269_v8 }
 0x2d0   :  { %v1520_v40 = vpop.permute.xlu0 %778 }
 0x2d8   :  { %v1522_v43 = vpop.permute.xlu0 %780 }
 0x2db   :  { %v1528_v44 = vpop.permute.xlu1 %768 }
 0x2dc   :  { %v774_v37 = vmax.f32 %v1491_v23, %v1528_v44 }
 0x2e3   :  { %770 = vrot.lane.b32.xlu2 %v751_v38, %s1200_s8 }
 0x303   :  { %v241_v45 = vpop.xlane.xlu0 %240 }
 0x304   :  { %vm242_vm7 = vcmp.eq.f32.partialorder %v239_v42, %v241_v45  ;;  %v247_v20 = vcvt.f32.s32 %v241_v45 }
 0x305   :  { %v243_v53 = vsel %vm242_vm7, %v238_v50, inf }
 0x306   :  { %244 = vmin.xlane.f32.xlu1 %v243_v53  ;;  %v248_v22 = vshll.u32 %v247_v20, 16 }
 0x316   :  { %v848_v61 = vpop.permute.xlu0 %847 }
 0x31f   :  { %782 = vrot.lane.b32.xlu1 %v763_v54, %s1200_s8 }
 0x336   :  { %v226_v58 = vpop.xlane.xlu2 %225 }
 0x337   :  { %vm227_vm8 = vcmp.eq.f32.partialorder %v224_v4, %v226_v58  ;;  %v193_v4 = vsel %vm189_vm14, 1.0, %v1199_v55  ;;  %v232_v47 = vcvt.f32.s32 %v226_v58 }
 0x338   :  { %v256_v10 = vpop.xlane.xlu1 %255  ;;  %v228_v49 = vsel %vm227_vm8, %v223_v60, inf }
 0x339   :  { %vm257_vm9 = vcmp.eq.f32.partialorder %v254_v29, %v256_v10  ;;  %229 = vmin.xlane.f32.xlu2 %v228_v49 }
 0x33a   :  { %v258_v42 = vsel %vm257_vm9, %v253_v13, inf  ;;  %v233_v13 = vshll.u32 %v232_v47, 16 }
 0x33b   :  { %259 = vmin.xlane.f32.xlu0 %v258_v42 }
 0x33e   :  { %v271_v48 = vpop.xlane.xlu2 %270 }
 0x33f   :  { %vm272_vm10 = vcmp.eq.f32.partialorder %v269_v8, %v271_v48 }
 0x340   :  { %v273_v19 = vsel %vm272_vm10, %v268_v52, inf }
 0x341   :  { %274 = vmin.xlane.f32.xlu2 %v273_v19  ;;  %v192_v19 = vsel %vm188_vm15, 1.0, %v1199_v55 }
 0x346   :  { %v771_v16 = vpop.permute.xlu2 %770 }
 0x347   :  { %v775_v46 = vmax.f32 %v751_v38, %v771_v16  ;;  %v785_v16 = vmin.f32 %v1481_v39, %v1520_v40 }
 0x379   :  { %v245_v27 = vpop.xlane.xlu1 %244 }
 0x37a   :  { %v246_v25 = vcvt.f32.s32 %v245_v27 }
 0x37c   :  { %v249_v31 = vadd.s32 %v248_v22, %v246_v25 }
 0x37e   :  { %vm281_vm11 = vcmp.eq.s32.totalorder %v1376_v33, %v249_v31 }
 0x37f   :  { %v289_v29 = vsel %vm281_vm11, -1.0, %v1439_v63  ;;  %v1536_v34 = vsel %vm281_vm11, 1.0, %v193_v4  ;;  %v262_v63 = vcvt.f32.s32 %v256_v10 }
 0x380   :  { %v295_v35 = vsel %vm41_vm0, %v289_v29, -inf }
 0x381   :  { %296 = vmax.xlane.f32.xlu0 %v295_v35  ;;  %v263_v49 = vshll.u32 %v262_v63, 16 }
 0x391   :  { %v783_v8 = vpop.permute.xlu1 %782 }
 0x392   :  { %v787_v45 = vmin.f32 %v763_v54, %v783_v8  ;;  %v277_v54 = vcvt.f32.s32 %v271_v48  ;;  %v773_v8 = vmax.f32 %v1445_v26, %v1526_v57 }
 0x394   :  { %v793_v50 = vsub.f32 %v775_v46, %v787_v45  ;;  %v278_v25 = vshll.u32 %v277_v54, 16  ;;  %v791_v46 = vsub.f32 %v773_v8, %v785_v16 }
 0x396   :  { %v1541_v53 = vsel %vm1499_vm3, %v793_v50, 0.0 }
 0x397   :  { %853 = vrot.lane.b32.xlu0 %v1541_v53, %s1201_s9 }
 0x3ac   :  { %v230_v51 = vpop.xlane.xlu2 %229 }
 0x3ad   :  { %v231_v42 = vcvt.f32.s32 %v230_v51 }
 0x3ae   :  { %v260_v60 = vpop.xlane.xlu0 %259 }
 0x3af   :  { %v261_v14 = vcvt.f32.s32 %v260_v60  ;;  %v234_v52 = vadd.s32 %v233_v13, %v231_v42 }
 0x3b1   :  { %v264_v38 = vadd.s32 %v263_v49, %v261_v14  ;;  %vm280_vm12 = vcmp.eq.s32.totalorder %v1376_v33, %v234_v52 }
 0x3b2   :  { %v288_v58 = vsel %vm280_vm12, -1.0, %v1458_v36  ;;  %v1552_v10 = vsel %vm280_vm12, 1.0, %v192_v19  ;;  %v195_v36 = vsel %vm191_vm1, 1.0, %v1199_v55  ;;  %v786_v55 = vmin.f32 %v1486_v41, %v1522_v43 }
 0x3b3   :  { %vm282_vm13 = vcmp.eq.s32.totalorder %v1376_v33, %v264_v38  ;;  %v292_v48 = vsel %vm41_vm0, %v288_v58, -inf  ;;  %vm704_vm1 = vcmask 261120  }
 0x3b4   :  { %v290_v20 = vsel %vm282_vm13, -1.0, %v1463_v18  ;;  %v1556_v27 = vsel %vm282_vm13, 1.0, %v1429_v56  ;;  %293 = vmax.xlane.f32.xlu2 %v292_v48  ;;  %v275_v28 = vpop.xlane.xlu2 %274  ;;  %v792_v45 = vsub.f32 %v774_v37, %v786_v55  ;;  %v859_v41 = vsel %vm704_vm1, %v848_v61, 0.0 }
 0x3b5   :  { %v298_v22 = vsel %vm41_vm0, %v290_v20, -inf  ;;  %v276_v31 = vcvt.f32.s32 %v275_v28  ;;  %v800_v52 = vsel %vm704_vm1, %v1505_v7, 0.0 }
 0x3b6   :  { %299 = vmax.xlane.f32.xlu1 %v298_v22  ;;  %v798_v50 = vsel %vm1499_vm3, %v792_v45, 0.0 }
 0x3b7   :  { %v279_v4 = vadd.s32 %v278_v25, %v276_v31  ;;  %v809_v25 = vsel %vm704_vm1, %v1541_v53, 0.0  ;;  %v806_v31 = vsel %vm704_vm1, %v798_v50, 0.0 }
 0x3b9   :  { %vm283_vm14 = vcmp.eq.s32.totalorder %v1376_v33, %v279_v4 }
 0x3ba   :  { %v291_v56 = vsel %vm283_vm14, -1.0, %v1477_v1  ;;  %v1566_v18 = vsel %vm283_vm14, 1.0, %v195_v36  ;;  %v797_v1 = vsel %vm1499_vm3, %v791_v46, 0.0 }
 0x3bb   :  { %v301_v35 = vsel %vm41_vm0, %v291_v56, -inf  ;;  %v803_v28 = vsel %vm704_vm1, %v797_v1, 0.0 }
 0x3bc   :  { %302 = vmax.xlane.f32.xlu2 %v301_v35 }
 0x3cf   :  { %849 = vrot.lane.b32.xlu1 %v797_v1, %s1201_s9 }
 0x3d4   :  { %851 = vrot.lane.b32.xlu2 %v798_v50, %s1201_s9 }
 0x3f4   :  { %v297_v39 = vpop.xlane.xlu0 %296 }
 0x3f5   :  { %vm305_vm15 = vcmp.eq.f32.partialorder %v289_v29, %v297_v39 }
 0x3f6   :  { %v309_v26 = vsel %vm305_vm15, %v1376_v33, 16 }
 0x3f7   :  { %v327_v23 = vsel %vm41_vm0, %v309_v26, 2147483647 }
 0x3f8   :  { %v329_v40 = vshra.s32 %v327_v23, 16  ;;  %v328_v36 = vand.u32 65535, %v327_v23 }
 0x3fa   :  { %v331_v43 = vcvt.s32.f32 %v329_v40  ;;  %v330_v35 = vcvt.s32.f32 %v328_v36  ;;  %v813_v36 = vstv %s812_s12 }
 0x3fd   :  { %860 = vadd.xlane.f32.xlu2 %v859_v41 }
 0x405   :  { %332 = vmin.xlane.f32.xlu2 %v331_v43 }
 0x427   :  { %v294_v57 = vpop.xlane.xlu2 %293 }
 0x428   :  { %vm304_vm3 = vcmp.eq.f32.partialorder %v288_v58, %v294_v57  ;;  %v872_v57 = vstv %s1061_s10 }
 0x429   :  { %v308_v63 = vsel %vm304_vm3, %v1376_v33, 16  ;;  %v300_v60 = vpop.xlane.xlu1 %299 }
 0x42a   :  { %v312_v61 = vsel %vm41_vm0, %v308_v63, 2147483647  ;;  %vm306_vm4 = vcmp.eq.f32.partialorder %v290_v20, %v300_v60  ;;  %v854_v20 = vpop.permute.xlu0 %853 }
 0x42b   :  { %v314_v42 = vshra.s32 %v312_v61, 16  ;;  %v310_v14 = vsel %vm306_vm4, %v1376_v33, 16  ;;  %v868_v7 = vsel %vm704_vm1, %v854_v20, 0.0  ;;  %v313_v1 = vand.u32 65535, %v312_v61 }
 0x42c   :  { %v342_v19 = vsel %vm41_vm0, %v310_v14, 2147483647 }
 0x42d   :  { %v316_v38 = vcvt.s32.f32 %v314_v42  ;;  %v344_v48 = vshra.s32 %v342_v19, 16  ;;  %v315_v50 = vcvt.s32.f32 %v313_v1  ;;  %v343_v23 = vand.u32 65535, %v342_v19 }
 0x42f   :  { %v303_v44 = vpop.xlane.xlu2 %302  ;;  %v346_v22 = vcvt.s32.f32 %v344_v48  ;;  %v345_v40 = vcvt.s32.f32 %v343_v23 }
 0x430   :  { %vm307_vm2 = vcmp.eq.f32.partialorder %v291_v56, %v303_v44  ;;  %v874_v44 = vmul.f32 0.125, %v872_v57 }
 0x431   :  { %v311_v62 = vsel %vm307_vm2, %v1376_v33, 16 }
 0x432   :  { %v357_v47 = vsel %vm41_vm0, %v311_v62, 2147483647  ;;  %v875_v62 = vfloor.f32 %v874_v44 }
 0x433   :  { %v359_v29 = vshra.s32 %v357_v47, 16  ;;  %v358_v8 = vand.u32 65535, %v357_v47 }
 0x434   :  { %1104 = vrcp.f32 %v875_v62  ;;  %vm885_vm9 = vweird.f32 %v875_v62  ;;  %v889_v14 = vand.u32 2147483647, %v875_v62 }
 0x435   :  { %v361_v51 = vcvt.s32.f32 %v359_v29  ;;  %v360_v37 = vcvt.s32.f32 %v358_v8 }
 0x436   :  { %vm890_vm12 = vcmp.eq.f32.partialorder %v889_v14, 8.507059e+37 }
 0x437   :  { %v852_v13 = vpop.permute.xlu2 %851  ;;  %362 = vmin.xlane.f32.xlu2 %v361_v51 }
 0x438   :  { %v865_v49 = vsel %vm704_vm1, %v852_v13, 0.0 }
 0x439   :  { %866 = vadd.xlane.f32.xlu0 %v865_v49  ;;  %v891_v49 = vand.u32 2147483648, %v875_v62 }
 0x43a   :  { %v1105_v29 = vpop.eup %1104 }
 0x43b   :  { %v881_v63 = vmul.f32 %v1105_v29, %v875_v62  ;;  %vm886_vm10 = vweird.f32 %v1105_v29  ;;  %v892_v19 = vor.u32 1.1754944e-38, %v891_v49 }
 0x43c   :  { %vm887_vm11 = vmor %vm885_vm9, %vm886_vm10  ;;  %vm427_vm9 = vcmp.eq.f32.partialorder %v1298_v30, inf  ;;  %vm429_vm10 = vcmp.eq.f32.partialorder %v1298_v30, 0.0 }
 0x43f   :  { %801 = vadd.xlane.f32.xlu2 %v800_v52 }
 0x441   :  { %v850_v54 = vpop.permute.xlu1 %849  ;;  %317 = vmin.xlane.f32.xlu0 %v316_v38 }
 0x442   :  { %v862_v58 = vsel %vm704_vm1, %v850_v54, 0.0 }
 0x443   :  { %863 = vadd.xlane.f32.xlu1 %v862_v58 }
 0x449   :  { %804 = vadd.xlane.f32.xlu0 %v803_v28 }
 0x44b   :  { %347 = vmin.xlane.f32.xlu1 %v346_v22 }
 0x451   :  { %810 = vadd.xlane.f32.xlu0 %v809_v25 }
 0x453   :  { %869 = vadd.xlane.f32.xlu1 %v868_v7 }
 0x45b   :  { %807 = vadd.xlane.f32.xlu1 %v806_v31 }
 0x470   :  { %v1601_v4 = vpop.xlane.xlu2 %860 }
 0x478   :  { %v333_v56 = vpop.xlane.xlu2 %332 }
 0x479   :  { %vm334_vm5 = vcmp.eq.f32.partialorder %v331_v43, %v333_v56  ;;  %v339_v61 = vcvt.f32.s32 %v333_v56  ;;  %v815_v56 = vmul.f32 0.125, %v813_v36 }
 0x47a   :  { %v335_v16 = vsel %vm334_vm5, %v330_v35, inf }
 0x47b   :  { %336 = vmin.xlane.f32.xlu1 %v335_v16  ;;  %v816_v35 = vfloor.f32 %v815_v56 }
 0x47d   :  { %1106 = vrcp.f32 %v816_v35  ;;  %vm826_vm15 = vweird.f32 %v816_v35 }
 0x47e   :  { %1108 = vrsqrt.f32 %v1292_v24 }
 0x47f   :  { %1110 = vrsqrt.f32 %v1298_v30 }
 0x4aa   :  { %v363_v46 = vpop.xlane.xlu2 %362 }
 0x4ab   :  { %vm364_vm6 = vcmp.eq.f32.partialorder %v361_v51, %v363_v46  ;;  %v882_v51 = vsub.f32 1.0, %v881_v63 }
 0x4ac   :  { %v1603_v53 = vpop.xlane.xlu0 %866  ;;  %v365_v55 = vsel %vm364_vm6, %v360_v37, inf }
 0x4ad   :  { %366 = vmin.xlane.f32.xlu2 %v365_v55  ;;  %v883_v13 = vmul.f32 %v1105_v29, %v882_v51  ;;  %v876_v51 = vmul.f32 0.5, %v1601_v4 }
 0x4af   :  { %v884_v42 = vadd.f32 %v1105_v29, %v883_v13 }
 0x4b1   :  { %v888_v58 = vsel %vm887_vm11, %v1105_v29, %v884_v42 }
 0x4b2   :  { %v1614_v28 = vsel %vm890_vm12, %v892_v19, %v888_v58  ;;  %v1623_v16 = vpop.xlane.xlu2 %801  ;;  %vm535_vm12 = vweird.f32 %v1326_v3 }
 0x4b3   :  { %v894_v42 = vmul.f32 %v1614_v28, %v876_v51 }
 0x4b4   :  { %v1605_v45 = vpop.xlane.xlu0 %317 }
 0x4b5   :  { %vm319_vm7 = vcmp.eq.f32.partialorder %v316_v38, %v1605_v45  ;;  %v340_v38 = vshll.u32 %v339_v61, 16  ;;  %v832_v61 = vand.u32 2147483648, %v816_v35 }
 0x4b6   :  { %v864_v39 = vpop.xlane.xlu1 %863  ;;  %v320_v26 = vsel %vm319_vm7, %v315_v50, inf  ;;  %vm403_vm7 = vcmp.eq.f32.partialorder %v1292_v24, inf }
 0x4b7   :  { %321 = vmin.xlane.f32.xlu0 %v320_v26  ;;  %v877_v48 = vmul.f32 0.5, %v864_v39  ;;  %v833_v58 = vor.u32 1.1754944e-38, %v832_v61 }
 0x4b9   :  { %v895_v25 = vmul.f32 %v1614_v28, %v877_v48 }
 0x4bc   :  { %v1625_v8 = vpop.xlane.xlu0 %804 }
 0x4be   :  { %v1608_v41 = vpop.xlane.xlu1 %347 }
 0x4bf   :  { %vm349_vm8 = vcmp.eq.f32.partialorder %v346_v22, %v1608_v41 }
 0x4c0   :  { %v350_v43 = vsel %vm349_vm8, %v345_v40, inf  ;;  %vm405_vm8 = vcmp.eq.f32.partialorder %v1292_v24, 0.0 }
 0x4c1   :  { %351 = vmin.xlane.f32.xlu0 %v350_v43  ;;  %v324_v43 = vcvt.f32.s32 %v1605_v45  ;;  %v354_v45 = vcvt.f32.s32 %v1608_v41  ;;  %v878_v41 = vmul.f32 0.5, %v1603_v53 }
 0x4c3   :  { %v325_v29 = vshll.u32 %v324_v43, 16  ;;  %v355_v4 = vshll.u32 %v354_v45, 16 }
 0x4c4   :  { %v1627_v50 = vpop.xlane.xlu0 %810 }
 0x4c6   :  { %v870_v47 = vpop.xlane.xlu1 %869 }
 0x4c7   :  { %v879_v39 = vmul.f32 0.5, %v870_v47 }
 0x4c9   :  { %v897_v57 = vmul.f32 %v1614_v28, %v879_v39  ;;  %v818_v39 = vmul.f32 0.5, %v1625_v8 }
 0x4ce   :  { %v1611_v60 = vpop.xlane.xlu1 %807 }
 0x4ee   :  { %v337_v52 = vpop.xlane.xlu1 %336 }
 0x4ef   :  { %v338_v54 = vcvt.f32.s32 %v337_v52 }
 0x4f1   :  { %v341_v22 = vadd.s32 %v340_v38, %v338_v54 }
 0x4f3   :  { %vm373_vm13 = vcmp.eq.s32.totalorder %v1376_v33, %v341_v22  ;;  %v819_v22 = vmul.f32 0.5, %v1611_v60 }
 0x4f4   :  { %v377_v20 = vsel %vm373_vm13, 1.0, %v1536_v34  ;;  %v369_v34 = vcvt.f32.s32 %v363_v46 }
 0x4f5   :  { %v1619_v7 = vmul.f32 %v377_v20, %v1348_v17  ;;  %v1107_v17 = vpop.eup %1106 }
 0x4f6   :  { %v370_v55 = vshll.u32 %v369_v34, 16  ;;  %v822_v23 = vmul.f32 %v1107_v17, %v816_v35  ;;  %vm827_vm2 = vweird.f32 %v1107_v17 }
 0x4f7   :  { %v899_v31 = vmul.f32 %v895_v25, %v1619_v7  ;;  %vm828_vm4 = vmor %vm826_vm15, %vm827_vm2  ;;  %v896_v25 = vmul.f32 %v1614_v28, %v878_v41 }
 0x4f8   :  { %v823_v46 = vsub.f32 1.0, %v822_v23 }
 0x4f9   :  { %908 = vrot.lane.b32.xlu1 %v899_v31, %s1202_s11 }
 0x520   :  { %v367_v37 = vpop.xlane.xlu2 %366 }
 0x521   :  { %v368_v1 = vcvt.f32.s32 %v367_v37 }
 0x523   :  { %v371_v26 = vadd.s32 %v370_v55, %v368_v1 }
 0x525   :  { %vm375_vm14 = vcmp.eq.s32.totalorder %v1376_v33, %v371_v26 }
 0x526   :  { %v379_v40 = vsel %vm375_vm14, 1.0, %v1566_v18  ;;  %v824_v18 = vmul.f32 %v1107_v17, %v823_v46  ;;  %vm505_vm14 = vweird.f32 %v1328_v6 }
 0x527   :  { %v1634_v44 = vmul.f32 %v379_v40, %v1362_v5  ;;  %v830_v5 = vand.u32 2147483647, %v816_v35 }
 0x528   :  { %v825_v14 = vadd.f32 %v1107_v17, %v824_v18 }
 0x529   :  { %978 = vmatpush.msra.mxu1 %v1634_v44  ;;  %1068 = vmatpush.msra.mxu2 %v1634_v44  ;;  %v901_v62 = vmul.f32 %v897_v57, %v1634_v44  ;;  %vm831_vm5 = vcmp.eq.f32.partialorder %v830_v5, 8.507059e+37  ;;  %v439_v37 = vmul.f32 %v1634_v44, %v1634_v44 }
 0x52a   :  { %v322_v47 = vpop.xlane.xlu0 %321  ;;  %v829_v48 = vsel %vm828_vm4, %v1107_v17, %v825_v14 }
 0x52b   :  { %v323_v63 = vcvt.f32.s32 %v322_v47  ;;  %v834_v20 = vsel %vm831_vm5, %v833_v58, %v829_v48  ;;  %v449_v55 = vsel %vm41_vm0, %v439_v37, 0.0  ;;  %v430_v48 = vand.u32 2147483648, %v1298_v30 }
 0x52c   :  { %v837_v31 = vmul.f32 %v834_v20, %v819_v22  ;;  %v836_v23 = vmul.f32 %v834_v20, %v818_v39 }
 0x52d   :  { %v326_v13 = vadd.s32 %v325_v29, %v323_v63  ;;  %v820_v29 = vmul.f32 0.5, %v1627_v50 }
 0x52e   :  { %v840_v43 = vmul.f32 %v836_v23, %v1619_v7 }
 0x52f   :  { %vm372_vm3 = vcmp.eq.s32.totalorder %v1376_v33, %v326_v13  ;;  %v838_v18 = vmul.f32 %v834_v20, %v820_v29 }
 0x530   :  { %v376_v49 = vsel %vm372_vm3, 1.0, %v1552_v10 }
 0x531   :  { %v380_v52 = vmul.f32 %v376_v49, %v1316_v59  ;;  %v842_v5 = vmul.f32 %v838_v18, %v1634_v44 }
 0x533   :  { %v898_v54 = vmul.f32 %v894_v42, %v380_v52 }
 0x534   :  { %v352_v38 = vpop.xlane.xlu0 %351 }
 0x535   :  { %v353_v19 = vcvt.f32.s32 %v352_v38  ;;  %906 = vrot.lane.b32.xlu2 %v898_v54, %s1202_s11 }
 0x537   :  { %v356_v10 = vadd.s32 %v355_v4, %v353_v19  ;;  %v406_v4 = vand.u32 2147483648, %v1292_v24 }
 0x539   :  { %vm374_vm6 = vcmp.eq.s32.totalorder %v1376_v33, %v356_v10 }
 0x53a   :  { %v378_v59 = vsel %vm374_vm6, 1.0, %v1556_v27  ;;  %v436_v27 = vmul.f32 %v380_v52, %v380_v52 }
 0x53b   :  { %v382_v36 = vmul.f32 %v378_v59, %v1324_v2  ;;  %v437_v2 = vmul.f32 %v1619_v7, %v1619_v7 }
 0x53c   :  { %v440_v34 = vsel %vm41_vm0, %v436_v27, 0.0  ;;  %v511_v27 = vand.u32 2147483648, %v1328_v6 }
 0x53d   :  { %979 = vmatpush.msra.mxu1 %v382_v36  ;;  %1069 = vmatpush.msra.mxu2 %v382_v36  ;;  %v900_v56 = vmul.f32 %v896_v25, %v382_v36  ;;  %v438_v53 = vmul.f32 %v382_v36, %v382_v36  ;;  %v841_v35 = vmul.f32 %v837_v31, %v382_v36  ;;  %v443_v28 = vsel %vm41_vm0, %v437_v2, 0.0 }
 0x53e   :  { %912 = vrot.lane.b32.xlu2 %v901_v62, %s1202_s11  ;;  %v1735_v39 = vor.u32 1.1754944e-38, %v511_v27 }
 0x53f   :  { %980 = vmatpush.msra.mxu1 %v1619_v7  ;;  %v446_v60 = vsel %vm41_vm0, %v438_v53, 0.0  ;;  %1070 = vmatpush.msra.mxu2 %v1619_v7  ;;  %v1718_v53 = vshrl.u32 %v106_v32, 7  ;;  %v539_v32 = vand.u32 2147483647, %v1326_v3 }
 0x540   :  { %910 = vrot.lane.b32.xlu0 %v900_v56, %s1202_s11  ;;  %447 = vadd.xlane.f32.xlu1 %v446_v60 }
 0x541   :  { %981 = vmatpush.msra.mxu1 %v380_v52  ;;  %1071 = vmatpush.msra.mxu2 %v380_v52  ;;  %vm660_vm11 = vcmp.eq.s32.totalorder %v1718_v53, %v1376_v33  ;;  %vm1753_vm3 = vcmp.eq.f32.partialorder %v539_v32, 8.507059e+37 }
 0x559   :  { %668 = vrot.lane.b32.xlu1 %v1393_v0, %s1203_s13  ;;  %v817_v0 = vmul.f32 0.5, %v1623_v16 }
 0x561   :  { %672 = vrot.lane.b32.xlu1 %v1398_v12, %s1203_s13  ;;  %v835_v12 = vmul.f32 %v834_v20, %v817_v0 }
 0x563   :  { %v839_v1 = vmul.f32 %v835_v12, %v380_v52  ;;  %v509_v12 = vand.u32 2147483647, %v1328_v6 }
 0x567   :  { %444 = vadd.xlane.f32.xlu2 %v443_v28 }
 0x56a   :  { %441 = vadd.xlane.f32.xlu0 %v440_v34 }
 0x56b   :  { %v909_v40 = vpop.permute.xlu1 %908 }
 0x56c   :  { %v919_v57 = vsel %vm41_vm0, %v840_v43, %v909_v40 }
 0x56f   :  { %450 = vadd.xlane.f32.xlu2 %v449_v55 }
 0x587   :  { %670 = vrot.lane.b32.xlu2 %v1390_v9, %s1203_s13  ;;  %v1109_v9 = vpop.eup %1108 }
 0x588   :  { %v1111_v16 = vpop.eup %1110 }
 0x589   :  { %v421_v8 = vmul.f32 %v1111_v16, %v1298_v30 }
 0x58b   :  { %v422_v63 = vmul.f32 %v1111_v16, %v421_v8 }
 0x58d   :  { %v423_v13 = vmul.f32 0.5, %v422_v63 }
 0x58f   :  { %674 = vrot.lane.b32.xlu2 %v1396_v11, %s1203_s13  ;;  %v907_v17 = vpop.permute.xlu2 %906  ;;  %v397_v11 = vmul.f32 %v1109_v9, %v1292_v24  ;;  %v424_v42 = vsub.f32 1.5, %v423_v13 }
 0x590   :  { %v918_v26 = vsel %vm41_vm0, %v839_v1, %v907_v17  ;;  %v658_v17 = vadd.s32 16, %v1718_v53 }
 0x591   :  { %v398_v46 = vmul.f32 %v1109_v9, %v397_v11  ;;  %v425_v50 = vmul.f32 %v1111_v16, %v424_v42 }
 0x592   :  { %vm662_vm4 = vcmp.eq.s32.totalorder %v658_v17, %v1376_v33 }
 0x593   :  { %922 = vxpose.xlu0.b32.start [1/4] (short) (narrow) %v918_v26, 32  ;;  %v399_v47 = vmul.f32 0.5, %v398_v46  ;;  %v426_v44 = vmul.f32 %v425_v50, %v1298_v30  ;;  %v541_v26 = vand.u32 2147483648, %v1326_v3 }
 0x595   :  { %v400_v51 = vsub.f32 1.5, %v399_v47  ;;  %v428_v58 = vsel %vm427_vm9, %v1298_v30, %v426_v44 }
 0x596   :  { %v431_v10 = vsel %vm429_vm10, %v430_v48, %v428_v58  ;;  %v1792_v58 = vadd.s32 8, %v1718_v53 }
 0x597   :  { %v401_v61 = vmul.f32 %v1109_v9, %v400_v51 }
 0x598   :  { %v913_v45 = vpop.permute.xlu2 %912 }
 0x599   :  { %v921_v49 = vsel %vm41_vm0, %v842_v5, %v913_v45  ;;  %v402_v52 = vmul.f32 %v401_v61, %v1292_v24 }
 0x59b   :  { %923 = vxpose.xlu0.b32.cont [2/4] (short) (narrow) %v919_v57, 32  ;;  %v404_v38 = vsel %vm403_vm7, %v1292_v24, %v402_v52  ;;  %v1702_v24 = vmul.f32 %v431_v10, %v1356_v21 }
 0x59c   :  { %v407_v54 = vsel %vm405_vm8, %v406_v4, %v404_v38 }
 0x59d   :  { %v1694_v41 = vmul.f32 %v407_v54, %v1344_v15  ;;  %vm550_vm8 = vweird.f32 %v1702_v24  ;;  %v554_v44 = vand.u32 2147483647, %v1702_v24 }
 0x59f   :  { %v524_v57 = vand.u32 2147483647, %v1694_v41  ;;  %vm520_vm2 = vweird.f32 %v1694_v41  ;;  %v526_v29 = vand.u32 2147483648, %v1694_v41 }
 0x5a1   :  { %vm1763_vm6 = vcmp.eq.f32.partialorder %v524_v57, 8.507059e+37 }
 0x5b2   :  { %v911_v62 = vpop.permute.xlu0 %910 }
 0x5b3   :  { %v920_v7 = vsel %vm41_vm0, %v841_v35, %v911_v62  ;;  %v1681_v14 = vpop.xlane.xlu1 %447 }
 0x5b4   :  { %924 = vxpose.xlu0.b32.cont [3/4] (short) (narrow) %v920_v7, 32  ;;  %1112 = vrsqrt.f32 %v1681_v14  ;;  %v542_v7 = vor.u32 1.1754944e-38, %v541_v26  ;;  %vm483_vm5 = vcmp.eq.f32.partialorder %v1681_v14, inf  ;;  %v486_v52 = vand.u32 2147483648, %v1681_v14 }
 0x5b5   :  { %1114 = vrcp.f32 %v1326_v3  ;;  %vm485_vm10 = vcmp.eq.f32.partialorder %v1681_v14, 0.0 }
 0x5b6   :  { %1116 = vrcp.f32 %v1328_v6 }
 0x5b7   :  { %1118 = vrcp.f32 %v1694_v41 }
 0x5b8   :  { %1120 = vrcp.f32 %v1702_v24 }
 0x5ba   :  { %v1113_v19 = vpop.eup %1112 }
 0x5bb   :  { %v477_v22 = vmul.f32 %v1113_v19, %v1681_v14  ;;  %v1704_v59 = vpop.eup %1114 }
 0x5bc   :  { %925 = vxpose.xlu0.b32.end [4/4] (short) (narrow) %v921_v49, 32  ;;  %v1706_v25 = vpop.eup %1116  ;;  %v531_v30 = vmul.f32 %v1704_v59, %v1326_v3  ;;  %vm536_vm13 = vweird.f32 %v1704_v59 }
 0x5bd   :  { %v478_v20 = vmul.f32 %v1113_v19, %v477_v22  ;;  %v1711_v31 = vpop.eup %1118  ;;  %v501_v36 = vmul.f32 %v1706_v25, %v1328_v6  ;;  %vm506_vm15 = vweird.f32 %v1706_v25  ;;  %vm1771_vm7 = vmor %vm535_vm12, %vm536_vm13 }
 0x5be   :  { %v516_v21 = vmul.f32 %v1711_v31, %v1694_v41  ;;  %v532_v60 = vsub.f32 1.0, %v531_v30  ;;  %v1720_v2 = vpop.eup %1120  ;;  %vm521_vm9 = vweird.f32 %v1711_v31 }
 0x5bf   :  { %v479_v15 = vmul.f32 0.5, %v478_v20  ;;  %v502_v28 = vsub.f32 1.0, %v501_v36  ;;  %v546_v1 = vmul.f32 %v1720_v2, %v1702_v24  ;;  %vm1798_vm12 = vmor %vm520_vm2, %vm521_vm9  ;;  %vm551_vm13 = vweird.f32 %v1720_v2 }
 0x5c0   :  { %v517_v34 = vsub.f32 1.0, %v516_v21  ;;  %v533_v55 = vmul.f32 %v1704_v59, %v532_v60  ;;  %v556_v20 = vand.u32 2147483648, %v1702_v24  ;;  %v659_v21 = vadd.s32 24, %v1718_v53  ;;  %vm1815_vm2 = vmor %vm505_vm14, %vm506_vm15 }
 0x5c1   :  { %v480_v56 = vsub.f32 1.5, %v479_v15  ;;  %v503_v43 = vmul.f32 %v1706_v25, %v502_v28  ;;  %v547_v8 = vsub.f32 1.0, %v546_v1  ;;  %vm1837_vm14 = vmor %vm550_vm8, %vm551_vm13  ;;  %vm1841_vm15 = vcmp.eq.f32.partialorder %v554_v44, 8.507059e+37 }
 0x5c2   :  { %v518_v11 = vmul.f32 %v1711_v31, %v517_v34  ;;  %v534_v16 = vadd.f32 %v1704_v59, %v533_v55  ;;  %v557_v6 = vor.u32 1.1754944e-38, %v556_v20  ;;  %vm568_vm13 = vcmask 7168  }
 0x5c3   :  { %v481_v37 = vmul.f32 %v1113_v19, %v480_v56  ;;  %v1761_v63 = vadd.f32 %v1706_v25, %v503_v43  ;;  %v548_v50 = vmul.f32 %v1720_v2, %v547_v8 }
 0x5c4   :  { %v519_v5 = vadd.f32 %v1711_v31, %v518_v11  ;;  %v538_v61 = vsel %vm1771_vm7, %v1704_v59, %v534_v16 }
 0x5c5   :  { %v482_v9 = vmul.f32 %v481_v37, %v1681_v14  ;;  %v549_v36 = vadd.f32 %v1720_v2, %v548_v50 }
 0x5c6   :  { %v523_v30 = vsel %vm1798_vm12, %v1711_v31, %v519_v5  ;;  %v508_v31 = vsel %vm1815_vm2, %v1706_v25, %v1761_v63 }
 0x5c7   :  { %v484_v45 = vsel %vm483_vm5, %v1681_v14, %v482_v9  ;;  %v543_v14 = vsel %vm1753_vm3, %v542_v7, %v538_v61  ;;  %vm661_vm3 = vcmp.eq.s32.totalorder %v1792_v58, %v1376_v33  ;;  %v553_v43 = vsel %vm1837_vm14, %v1720_v2, %v549_v36 }
 0x5c8   :  { %v487_v48 = vsel %vm485_vm10, %v486_v52, %v484_v45  ;;  %vm663_vm5 = vcmp.eq.s32.totalorder %v659_v21, %v1376_v33 }
 0x5c9   :  { %v544_v60 = vmul.f32 %v543_v14, %v487_v48 }
 0x5cb   :  { %v669_v35 = vpop.permute.xlu1 %668  ;;  %v562_v9 = vsub.f32 1.0, %v544_v60 }
 0x5cc   :  { %v680_v23 = vsel %vm660_vm11, 0.0, %v669_v35  ;;  %v527_v35 = vor.u32 1.1754944e-38, %v526_v29 }
 0x5cd   :  { %v684_v62 = vand.u32 2147483647, %v680_v23  ;;  %v566_v48 = vmul.f32 %v562_v9, %v562_v9 }
 0x5ce   :  { %v528_v32 = vsel %vm1763_vm6, %v527_v35, %v523_v30 }
 0x5cf   :  { %v1057_v4 = vadd.f32 -0.3, %v684_v62  ;;  %v572_v1 = vsel %vm568_vm13, %v566_v48, 0.0 }
 0x5d1   :  { %v692_v41 = vmul.f32 1.4285511, %v1057_v4 }
 0x5d3   :  { %v673_v47 = vpop.permute.xlu1 %672  ;;  %v696_v57 = vmax.f32 %v692_v41, 0.0 }
 0x5d4   :  { %v682_v49 = vsel %vm662_vm4, 0.0, %v673_v47  ;;  %vm1827_vm4 = vcmp.eq.f32.partialorder %v509_v12, 8.507059e+37 }
 0x5d5   :  { %v686_v22 = vand.u32 2147483647, %v682_v49 }
 0x5d7   :  { %v1059_v55 = vadd.f32 -0.3, %v686_v22 }
 0x5d9   :  { %v694_v62 = vmul.f32 1.4285511, %v1059_v55 }
 0x5da   :  { %v1726_v0 = vpop.xlane.xlu2 %444 }
 0x5db   :  { %1122 = vrsqrt.f32 %v1726_v0  ;;  %vm471_vm6 = vcmp.eq.f32.partialorder %v1726_v0, inf  ;;  %vm473_vm7 = vcmp.eq.f32.partialorder %v1726_v0, 0.0  ;;  %v474_v2 = vand.u32 2147483648, %v1726_v0 }
 0x5dd   :  { %v1741_v40 = vpop.xlane.xlu0 %441 }
 0x5de   :  { %1124 = vrsqrt.f32 %v1741_v40  ;;  %vm459_vm8 = vcmp.eq.f32.partialorder %v1741_v40, inf  ;;  %vm461_vm9 = vcmp.eq.f32.partialorder %v1741_v40, 0.0  ;;  %v462_v51 = vand.u32 2147483648, %v1741_v40 }
 0x5e1   :  { %v1123_v13 = vpop.eup %1122 }
 0x5e2   :  { %v465_v3 = vmul.f32 %v1123_v13, %v1726_v0  ;;  %v1783_v42 = vpop.xlane.xlu2 %450 }
 0x5e3   :  { %1126 = vrsqrt.f32 %v1783_v42  ;;  %vm495_vm10 = vcmp.eq.f32.partialorder %v1783_v42, inf  ;;  %vm497_vm12 = vcmp.eq.f32.partialorder %v1783_v42, 0.0 }
 0x5e4   :  { %v1125_v38 = vpop.eup %1124  ;;  %v466_v54 = vmul.f32 %v1123_v13, %v465_v3  ;;  %v513_v3 = vsel %vm1827_vm4, %v1735_v39, %v508_v31  ;;  %v498_v39 = vand.u32 2147483648, %v1783_v42 }
 0x5e5   :  { %v453_v19 = vmul.f32 %v1125_v38, %v1741_v40 }
 0x5e6   :  { %v467_v59 = vmul.f32 0.5, %v466_v54  ;;  %v700_v54 = vmul.f32 %v696_v57, %v696_v57 }
 0x5e7   :  { %v454_v15 = vmul.f32 %v1125_v38, %v453_v19  ;;  %v698_v19 = vmax.f32 %v694_v62, 0.0 }
 0x5e8   :  { %v468_v27 = vsub.f32 1.5, %v467_v59  ;;  %v705_v21 = vsel %vm704_vm1, %v700_v54, 0.0 }
 0x5e9   :  { %v455_v28 = vmul.f32 0.5, %v454_v15  ;;  %v1127_v37 = vpop.eup %1126  ;;  %v702_v56 = vmul.f32 %v698_v19, %v698_v19 }
 0x5ea   :  { %v469_v12 = vmul.f32 %v1123_v13, %v468_v27  ;;  %v489_v26 = vmul.f32 %v1127_v37, %v1783_v42  ;;  %v671_v23 = vpop.permute.xlu2 %670 }
 0x5eb   :  { %v456_v17 = vsub.f32 1.5, %v455_v28  ;;  %v681_v24 = vsel %vm661_vm3, 0.0, %v671_v23 }
 0x5ec   :  { %v470_v11 = vmul.f32 %v469_v12, %v1726_v0  ;;  %v490_v46 = vmul.f32 %v1127_v37, %v489_v26  ;;  %v685_v8 = vand.u32 2147483647, %v681_v24 }
 0x5ed   :  { %v457_v16 = vmul.f32 %v1125_v38, %v456_v17 }
 0x5ee   :  { %v1058_v29 = vadd.f32 -0.3, %v685_v8  ;;  %v472_v7 = vsel %vm471_vm6, %v1726_v0, %v470_v11  ;;  %v491_v63 = vmul.f32 0.5, %v490_v46  ;;  %v558_v0 = vsel %vm1841_vm15, %v557_v6, %v553_v43 }
 0x5ef   :  { %v458_v47 = vmul.f32 %v457_v16, %v1741_v40  ;;  %v475_v18 = vsel %vm473_vm7, %v474_v2, %v472_v7  ;;  %v708_v6 = vsel %vm704_vm1, %v702_v56, 0.0 }
 0x5f0   :  { %v693_v13 = vmul.f32 1.4285511, %v1058_v29  ;;  %v492_v5 = vsub.f32 1.5, %v491_v63  ;;  %v529_v61 = vmul.f32 %v528_v32, %v475_v18 }
 0x5f1   :  { %v460_v45 = vsel %vm459_vm8, %v1741_v40, %v458_v47 }
 0x5f2   :  { %v463_v49 = vsel %vm461_vm9, %v462_v51, %v460_v45  ;;  %v697_v52 = vmax.f32 %v693_v13, 0.0  ;;  %v675_v50 = vpop.permute.xlu2 %674  ;;  %v493_v38 = vmul.f32 %v1127_v37, %v492_v5  ;;  %v561_v44 = vsub.f32 1.0, %v529_v61 }
 0x5f3   :  { %v514_v4 = vmul.f32 %v513_v3, %v463_v49  ;;  %v683_v40 = vsel %vm663_vm5, 0.0, %v675_v50  ;;  %v1206_v49 = vmov 6.0  }
 0x5f4   :  { %v701_v22 = vmul.f32 %v697_v52, %v697_v52  ;;  %v687_v10 = vand.u32 2147483647, %v683_v40  ;;  %v494_v14 = vmul.f32 %v493_v38, %v1783_v42  ;;  %v565_v59 = vmul.f32 %v561_v44, %v561_v44 }
 0x5f5   :  { %v560_v20 = vsub.f32 1.0, %v514_v4  ;;  %v995_v3 = vsel %vm660_vm11, 1.0, %v1206_v49  ;;  %v996_v50 = vsel %vm661_vm3, 1.0, %v1206_v49 }
 0x5f6   :  { %v706_v15 = vsel %vm704_vm1, %v701_v22, 0.0  ;;  %v1060_v30 = vadd.f32 -0.3, %v687_v10  ;;  %v496_v36 = vsel %vm495_vm10, %v1783_v42, %v494_v14  ;;  %v570_v31 = vsel %vm568_vm13, %v565_v59, 0.0 }
 0x5f7   :  { %v564_v41 = vmul.f32 %v560_v20, %v560_v20  ;;  %v499_v35 = vsel %vm497_vm12, %v498_v39, %v496_v36  ;;  %v707_v34 = vadd.f32 %v706_v15, %v705_v21 }
 0x5f8   :  { %v695_v60 = vmul.f32 1.4285511, %v1060_v30  ;;  %v559_v27 = vmul.f32 %v558_v0, %v499_v35 }
 0x5f9   :  { %v569_v28 = vsel %vm568_vm13, %v564_v41, 0.0  ;;  %v709_v17 = vadd.f32 %v708_v6, %v707_v34 }
 0x5fa   :  { %v571_v37 = vadd.f32 %v570_v31, %v569_v28  ;;  %v699_v55 = vmax.f32 %v695_v60, 0.0  ;;  %v563_v32 = vsub.f32 1.0, %v559_v27 }
 0x5fc   :  { %v573_v25 = vadd.f32 %v572_v1, %v571_v37  ;;  %v703_v42 = vmul.f32 %v699_v55, %v699_v55  ;;  %v567_v12 = vmul.f32 %v563_v32, %v563_v32 }
 0x5fe   :  { %v710_v26 = vsel %vm704_vm1, %v703_v42, 0.0  ;;  %v574_v23 = vsel %vm568_vm13, %v567_v12, 0.0 }
 0x5ff   :  { %v711_v43 = vadd.f32 %v710_v26, %v709_v17  ;;  %v575_v57 = vadd.f32 %v574_v23, %v573_v25 }
 0x601   :  { %712 = vadd.xlane.f32.xlu2 %v711_v43  ;;  %576 = vadd.xlane.f32.xlu1 %v575_v57 }
 0x648   :  { %v938_v24 = vpop.trf.xlu0 }
 0x649   :  { %1062 = vmatmul.msk.f32.vlgmr.msra.gmra.mxu1 %vm704_vm1, %v938_v24 }
 0x650   :  { %v939_v9 = vpop.trf.xlu0 }
 0x651   :  { %1063 = vmatmul.msk.f32.gmra.mxu1 %vm704_vm1, %v939_v9 }
 0x658   :  { %v940_v11 = vpop.trf.xlu0 }
 0x659   :  { %1064 = vmatmul.msk.f32.vlgmr.msra.gmra.mxu2 %vm704_vm1, %v940_v11 }
 0x660   :  { %v941_v16 = vpop.trf.xlu0 }
 0x661   :  { %1065 = vmatmul.msk.f32.gmra.mxu2 %vm704_vm1, %v941_v16 }
 0x674   :  { %v713_v46 = vpop.xlane.xlu2 %712  ;;  %v577_v8 = vpop.xlane.xlu1 %576 }
 0x675   :  { %v714_v62 = vrot.slane %v713_v46, 4  ;;  %v578_v2 = vrot.slane %v577_v8, 4 }
 0x677   :  { %v715_v47 = vadd.f32 %v714_v62, %v713_v46  ;;  %v579_v29 = vadd.f32 %v578_v2, %v577_v8 }
 0x679   :  { %v716_v7 = vrot.slane %v715_v47, 2  ;;  %v580_v63 = vrot.slane %v579_v29, 2 }
 0x67b   :  { %v717_v51 = vadd.f32 %v716_v7, %v715_v47  ;;  %v581_v18 = vadd.f32 %v580_v63, %v579_v29 }
 0x67d   :  { %v582_v13 = vrot.slane %v581_v18, 1  ;;  %v718_v45 = vrot.slane %v717_v51, 1 }
 0x67f   :  { %v583_v5 = vadd.f32 %v582_v13, %v581_v18  ;;  %v719_v61 = vadd.f32 %v718_v45, %v717_v51 }
 0x681   :  { %1072 = vpush %v583_v5 }
 0x682   :  { %1074 = vpush %v719_v61 }
 0x6b2   :  { %s1073_s17 = spop %1072 }
 0x6b3   :  { %s585_s21 = smul.f32 0.03125, %s1073_s17  ;;  %s1075_s22 = spop %1074 }
 0x6b4   :  { %s721_s23 = smul.f32 0.0009765625, %s1075_s22 }
 0x6b5   :  { %587 = sst [smem:[#allocation7]] %s585_s21 }
 0x6b6   :  { %723 = sst [smem:[#allocation8]] %s721_s23 }
 0x6b7   :  { %1026 = dma.smem_to_hbm %s1204_s24, 16, %s1024_s16, [#allocation4]  }
 0x6b8   :  { %1035 = dma.smem_to_hbm %s1205_s25, 16, %s1033_s20, [#allocation9]  }
 0x6c6   :  { %v983_v0 = vpop.f32.mrf.mxu1 }
 0x6c7   :  { %v997_v52 = vmul.f32 %v995_v3, %v983_v0 }
 0x6c9   :  { %1001 = vst.msk [vmem:[#allocation6] sm:$0xff] %vm41_vm0, %v997_v52 }
 0x6ce   :  { %v986_v38 = vpop.f32.mrf.mxu1 }
 0x6cf   :  { %v998_v4 = vmul.f32 %v996_v50, %v986_v38 }
 0x6d1   :  { %1002 = vst.msk [vmem:[#allocation6 + $0x8] sm:$0xff] %vm41_vm0, %v998_v4 }
 0x6dc   :  { %v989_v44 = vpop.f32.mrf.mxu2 }
 0x6dd   :  { %v999_v54 = vmul.f32 %v995_v3, %v989_v44 }
 0x6df   :  { %1003 = vst.msk [vmem:[#allocation6 + $0x10] sm:$0xff] %vm41_vm0, %v999_v54 }
 0x6e4   :  { %v992_v53 = vpop.f32.mrf.mxu2 }
 0x6e5   :  { %v1000_v19 = vmul.f32 %v996_v50, %v992_v53 }
 0x6e7   :  { %1004 = vst.msk [vmem:[#allocation6 + $0x18] sm:$0xff] %vm41_vm0, %v1000_v19 }
 0x6e8   :  { %1017 = dma.vmem_to_hbm [thread:$0]  %s1010_s5, 512, %s1012_s27, [#allocation3], %s1208_s28, %s1208_s28, %s1209_s1  }
 0x6e9   :  { %1190 = dma.done.wait [#allocation3], 512  }
 0x6ea   :  { %1191 = vsyncadd [#allocation3], 4294966784 }
 0x6eb   :  { %1192 = dma.done.wait [#allocation4], 16  }
 0x6ec   :  { %1193 = vsyncadd [#allocation4], 4294967280 }
 0x6ed   :  { %1194 = dma.done.wait [#allocation9], 16  }
 0x6ee   :  { %1195 = vsyncadd [#allocation9], 4294967280 }
 0x6ef   :  { %1048 = sfence }
 0x6f0   :  { %1049 = vsyncpa [#allocation3], 1 }
 0x6f1   :  { %1050 = vsyncpa [#allocation4], 1 }
 0x6f2   :  { %1051 = vsyncpa [#allocation9], 1 }
 0x6f3   :  { %1052 = vsyncpa [#allocation5], 1 }

</bundles_post_ra>
